<compile_context>
chip_gen: v7x
topology: tpu7x:2x2x1
jax: 0.10.0
libtpu: 0.0.40
codegen_flags: <defaults>
</compile_context>

<pallas_src>
import functools
import math

import jax
import jax.numpy as jnp
from jax.experimental import pallas as pl
from jax.experimental.pallas import tpu as pltpu

_LN_EPS = 1e-5
_NEG = -1e30  # finite "-inf" so softmax never sees an all -inf row -> no NaN
_VMEM_LIMIT = 48 * 1024 * 1024
_PARALLEL1D = pltpu.CompilerParams(
    dimension_semantics=("parallel",), vmem_limit_bytes=_VMEM_LIMIT)


def _row_tile(n, cap=512):
    """Largest row tile <= cap that divides n (falls back to a single block)."""
    for t in (cap, 256, 128, 64, 32, 16, 8):
        if t <= n and n % t == 0:
            return t
    return n


# ------------------------------ in-kernel math ------------------------------

def _layernorm(z, g, b):
    mean = jnp.mean(z, axis=-1, keepdims=True)
    var = jnp.mean(jnp.square(z - mean), axis=-1, keepdims=True)
    return (z - mean) * jax.lax.rsqrt(var + _LN_EPS) * g + b


def _gelu_tanh(y):
    # tanh-approximate GELU: the transcendental goes to the EUP slot.
    c = 0.7978845608028654  # sqrt(2/pi)
    return 0.5 * y * (1.0 + jnp.tanh(c * (y + 0.044715 * y * y * y)))


def _softmax_pv(s, v):
    # Row softmax (f32) followed by PV matmul (bf16 MXU, f32 accumulate).
    s = s - jnp.max(s, axis=-1, keepdims=True)
    p = jnp.exp(s)
    p = p * pl.reciprocal(jnp.sum(p, axis=-1, keepdims=True), approx=True)
    return jnp.dot(p.astype(v.dtype), v, preferred_element_type=jnp.float32)


# ----------------------------- Pallas kernels -----------------------------

def _linear_kernel(x_ref, w_ref, b_ref, o_ref):
    # y = x @ W + b      (W pre-transposed to [in, out], bf16; f32 accumulate)
    x = x_ref[...].astype(jnp.bfloat16)
    y = jnp.dot(x, w_ref[...], preferred_element_type=jnp.float32) + b_ref[...]
    o_ref[...] = y.astype(o_ref.dtype)


def _conv_gelu_ln_kernel(x_ref, w_ref, b_ref, g_ref, beta_ref, o_ref):
    # 1x1 conv (per-pixel linear over channels) + GELU + LayerNorm, fused.
    x = x_ref[...].astype(jnp.bfloat16)
    y = jnp.dot(x, w_ref[...], preferred_element_type=jnp.float32) + b_ref[...]
    o_ref[...] = _layernorm(_gelu_tanh(y), g_ref[...], beta_ref[...]).astype(o_ref.dtype)


def _linear_add_ln_kernel(x_ref, w_ref, b_ref, res_ref, g_ref, beta_ref, o_ref):
    # LayerNorm(res + (x @ W + b))   -- attention out-projection epilogue.
    x = x_ref[...].astype(jnp.bfloat16)
    y = jnp.dot(x, w_ref[...], preferred_element_type=jnp.float32) + b_ref[...]
    o_ref[...] = _layernorm(res_ref[...] + y, g_ref[...], beta_ref[...]).astype(o_ref.dtype)


def _ffn_add_ln_kernel(x_ref, w1_ref, b1_ref, w2_ref, b2_ref, g_ref, beta_ref, o_ref):
    # LayerNorm(x + linear2(relu(linear1(x))))   -- FFN sublayer, fused.
    x = x_ref[...]
    h = jnp.dot(x.astype(jnp.bfloat16), w1_ref[...],
                preferred_element_type=jnp.float32) + b1_ref[...]
    h = jnp.maximum(h, 0.0)
    y = jnp.dot(h.astype(jnp.bfloat16), w2_ref[...],
                preferred_element_type=jnp.float32) + b2_ref[...]
    o_ref[...] = _layernorm(x + y, g_ref[...], beta_ref[...]).astype(o_ref.dtype)


def _mha(q, k, v, mask, nheads, o_ref):
    # q: [T, E] bf16; k, v: [S, E] bf16; mask: [T, S] f32 or None.
    # Heads are lane slices of width D = E // nheads; the 1/sqrt(D) scale is
    # already folded into the Q projection weights.  Each head's [T, D] output
    # is written into its lane slice of the (1, T, E) block (the HBM writeback
    # is the full lane-dense E-wide block).
    e = q.shape[-1]
    d = e // nheads
    for h in range(nheads):
        sl = slice(h * d, (h + 1) * d)
        s = jnp.dot(q[:, sl], k[:, sl].T, preferred_element_type=jnp.float32)
        if mask is not None:
            s = s + mask
        o_ref[0, :, sl] = _softmax_pv(s, v[:, sl]).astype(o_ref.dtype)


def _self_attn_kernel(qkv_ref, padneg_ref, o_ref, *, nheads):
    # Self attention on the fused QKV block, causal + key-padding mask built
    # in-kernel (cheap VPU filler) from iota and a [1, T] additive pad vector.
    t, e = o_ref.shape[1], o_ref.shape[2]
    qkv = qkv_ref[0]                                   # [T, 3E] bf16
    row = jax.lax.broadcasted_iota(jnp.int32, (t, t), 0)
    col = jax.lax.broadcasted_iota(jnp.int32, (t, t), 1)
    mask = jnp.where(col > row, jnp.float32(_NEG), 0.0) + padneg_ref[0]
    _mha(qkv[:, :e], qkv[:, e:2 * e], qkv[:, 2 * e:], mask, nheads, o_ref)


def _cross_attn_kernel(q_ref, kv_ref, o_ref, *, nheads):
    # Cross attention: Q from the target stream, fused KV from the memory.
    e = o_ref.shape[2]
    kv = kv_ref[0]                                     # [S, 2E] bf16
    _mha(q_ref[0], kv[:, :e], kv[:, e:], None, nheads, o_ref)


# ----------------------------- kernel wrappers -----------------------------

def linear(x, w, b, out_dtype=jnp.float32):
    n, k = x.shape
    m = w.shape[1]
    tr = _row_tile(n)
    return pl.pallas_call(
        _linear_kernel,
        out_shape=jax.ShapeDtypeStruct((n, m), out_dtype),
        grid=(n // tr,),
        in_specs=[pl.BlockSpec((tr, k), lambda i: (i, 0)),
                  pl.BlockSpec((k, m), lambda i: (0, 0)),
                  pl.BlockSpec((1, m), lambda i: (0, 0))],
        out_specs=pl.BlockSpec((tr, m), lambda i: (i, 0)),
        compiler_params=_PARALLEL1D,
    )(x, w, b)


def conv_gelu_ln(x, w, b, g, beta, out_dtype=jnp.bfloat16):
    n, c = x.shape
    e = w.shape[1]
    tr = _row_tile(n)
    return pl.pallas_call(
        _conv_gelu_ln_kernel,
        out_shape=jax.ShapeDtypeStruct((n, e), out_dtype),
        grid=(n // tr,),
        in_specs=[pl.BlockSpec((tr, c), lambda i: (i, 0)),
                  pl.BlockSpec((c, e), lambda i: (0, 0)),
                  pl.BlockSpec((1, e), lambda i: (0, 0)),
                  pl.BlockSpec((1, e), lambda i: (0, 0)),
                  pl.BlockSpec((1, e), lambda i: (0, 0))],
        out_specs=pl.BlockSpec((tr, e), lambda i: (i, 0)),
        compiler_params=_PARALLEL1D,
    )(x, w, b, g, beta)


def linear_add_ln(x, w, b, res, g, beta):
    n, k = x.shape
    m = w.shape[1]
    tr = _row_tile(n)
    return pl.pallas_call(
        _linear_add_ln_kernel,
        out_shape=jax.ShapeDtypeStruct((n, m), jnp.float32),
        grid=(n // tr,),
        in_specs=[pl.BlockSpec((tr, k), lambda i: (i, 0)),
                  pl.BlockSpec((k, m), lambda i: (0, 0)),
                  pl.BlockSpec((1, m), lambda i: (0, 0)),
                  pl.BlockSpec((tr, m), lambda i: (i, 0)),
                  pl.BlockSpec((1, m), lambda i: (0, 0)),
                  pl.BlockSpec((1, m), lambda i: (0, 0))],
        out_specs=pl.BlockSpec((tr, m), lambda i: (i, 0)),
        compiler_params=_PARALLEL1D,
    )(x, w, b, res, g, beta)


def ffn_add_ln(x, w1, b1, w2, b2, g, beta):
    n, e = x.shape
    f = w1.shape[1]
    tr = _row_tile(n)
    return pl.pallas_call(
        _ffn_add_ln_kernel,
        out_shape=jax.ShapeDtypeStruct((n, e), jnp.float32),
        grid=(n // tr,),
        in_specs=[pl.BlockSpec((tr, e), lambda i: (i, 0)),
                  pl.BlockSpec((e, f), lambda i: (0, 0)),
                  pl.BlockSpec((1, f), lambda i: (0, 0)),
                  pl.BlockSpec((f, e), lambda i: (0, 0)),
                  pl.BlockSpec((1, e), lambda i: (0, 0)),
                  pl.BlockSpec((1, e), lambda i: (0, 0)),
                  pl.BlockSpec((1, e), lambda i: (0, 0))],
        out_specs=pl.BlockSpec((tr, e), lambda i: (i, 0)),
        compiler_params=_PARALLEL1D,
    )(x, w1, b1, w2, b2, g, beta)


def self_attention(qkv, pad_neg, nheads):
    # qkv: [B, T, 3E] bf16 (Q already pre-scaled); pad_neg: [B, 1, T] f32.
    b, t, e3 = qkv.shape
    e = e3 // 3
    return pl.pallas_call(
        functools.partial(_self_attn_kernel, nheads=nheads),
        out_shape=jax.ShapeDtypeStruct((b, t, e), jnp.bfloat16),
        grid=(b,),
        in_specs=[pl.BlockSpec((1, t, e3), lambda i: (i, 0, 0)),
                  pl.BlockSpec((1, 1, t), lambda i: (i, 0, 0))],
        out_specs=pl.BlockSpec((1, t, e), lambda i: (i, 0, 0)),
        compiler_params=_PARALLEL1D,
    )(qkv, pad_neg)


def cross_attention(q, kv, nheads):
    # q: [B, T, E] bf16 (pre-scaled); kv: [B, S, 2E] bf16.  No mask.
    b, t, e = q.shape
    s = kv.shape[1]
    return pl.pallas_call(
        functools.partial(_cross_attn_kernel, nheads=nheads),
        out_shape=jax.ShapeDtypeStruct((b, t, e), jnp.bfloat16),
        grid=(b,),
        in_specs=[pl.BlockSpec((1, t, e), lambda i: (i, 0, 0)),
                  pl.BlockSpec((1, s, 2 * e), lambda i: (i, 0, 0))],
        out_specs=pl.BlockSpec((1, t, e), lambda i: (i, 0, 0)),
        compiler_params=_PARALLEL1D,
    )(q, kv)


# ------------------------- transformer decoder glue -------------------------

def ocr_forward(feat, trg, params, *, nheads, vocab):
    b, c, hh, ww = feat.shape
    e = params['emb'].shape[1]
    t = trg.shape[1]
    hw = hh * ww

    # h = norm(gelu(conv(x)).flatten(2).permute(0,2,1))  ->  [B, HW, E] (bf16)
    x_tok = feat.transpose(0, 2, 3, 1).reshape(b * hw, c)      # NCHW -> tokens x channels
    h = conv_gelu_ln(x_tok, params['conv_w'], params['conv_b'],
                     params['norm_g'], params['norm_b']).reshape(b, hw, e)

    # Key-padding additive mask vector (finite -1e30); the causal part is
    # generated inside the self-attention kernel.  No cross-attention mask.
    pad_neg = jnp.where(trg == 0, jnp.float32(_NEG), jnp.float32(0.0))[:, None, :]

    # embedding + PositionalEncoding: the module adds pe[:batch] broadcast over
    # the sequence dim because trg is batch-first at that point — reproduced.
    x2 = (params['emb'][trg] + params['pe'][:b]).reshape(b * t, e)   # [B*T, E] f32

    for lp in params['layers']:                                # post-norm decoder layers
        # ---- self attention: fused QKV projection, heads split in-kernel ----
        qkv = linear(x2, lp['sa_qkv_w'], lp['sa_qkv_b'], out_dtype=jnp.bfloat16)
        sa = self_attention(qkv.reshape(b, t, 3 * e), pad_neg, nheads)   # [B,T,E] bf16
        x2 = linear_add_ln(sa.reshape(b * t, e), lp['sa_out_w'], lp['sa_out_b'],
                           x2, lp['ln1_g'], lp['ln1_b'])

        # ---- cross attention: Q on target, fused KV on memory, no mask ----
        q = linear(x2, lp['ca_q_w'], lp['ca_q_b'], out_dtype=jnp.bfloat16)
        kv = linear(h.reshape(b * hw, e), lp['ca_kv_w'], lp['ca_kv_b'],
                    out_dtype=jnp.bfloat16)
        ca = cross_attention(q.reshape(b, t, e), kv.reshape(b, hw, 2 * e), nheads)
        x2 = linear_add_ln(ca.reshape(b * t, e), lp['ca_out_w'], lp['ca_out_b'],
                           x2, lp['ln2_g'], lp['ln2_b'])

        # ---- feed forward: linear1 + relu + linear2 + add + LN, fused ----
        x2 = ffn_add_ln(x2, lp['w1'], lp['b1'], lp['w2'], lp['b2'],
                        lp['ln3_g'], lp['ln3_b'])

    # vocab head (output padded to a lane multiple, sliced here)
    logits = linear(x2, params['vocab_w'], params['vocab_b'])
    return logits[:, :vocab].reshape(b, t, vocab)


# ------------------------------ parameter init ------------------------------

def positional_encoding(max_len, d_model):
    position = jnp.arange(max_len, dtype=jnp.float32)[:, None]
    div_term = jnp.exp(jnp.arange(0, d_model, 2, dtype=jnp.float32)
                       * (-math.log(10000.0) / d_model))
    pe = jnp.zeros((max_len, d_model), jnp.float32)
    pe = pe.at[:, 0::2].set(jnp.sin(position * div_term))
    pe = pe.at[:, 1::2].set(jnp.cos(position * div_term))
    return pe[:, None, :]                                    # [max_len, 1, d_model]


def init_params(key, *, c_feat, hidden, num_layers, ffn_dim, vocab, max_len=128):
    """Parameters in PyTorch layout ([out, in] weights, fused in_proj)."""
    keys = iter(jax.random.split(key, 8 + 8 * num_layers))

    def w(shape, scale=0.02):
        return scale * jax.random.normal(next(keys), shape, jnp.float32)

    ones = lambda n: jnp.ones((n,), jnp.float32)
    zeros = lambda n: jnp.zeros((n,), jnp.float32)

    def attn_params():
        return {'in_proj_w': w((3 * hidden, hidden)),
                'in_proj_b': zeros(3 * hidden),
                'out_proj_w': w((hidden, hidden)),
                'out_proj_b': zeros(hidden)}

    layers = []
    for _ in range(num_layers):
        layers.append({
            'self_attn': attn_params(),
            'cross_attn': attn_params(),
            'ln1_g': ones(hidden), 'ln1_b': zeros(hidden),
            'ln2_g': ones(hidden), 'ln2_b': zeros(hidden),
            'ln3_g': ones(hidden), 'ln3_b': zeros(hidden),
            'w1': w((ffn_dim, hidden)), 'b1': zeros(ffn_dim),
            'w2': w((hidden, ffn_dim)), 'b2': zeros(hidden),
        })

    return {
        'conv_w': w((hidden, c_feat)),       # Conv2d(c_feat, hidden, 1) weight (1x1 squeezed)
        'conv_b': w((hidden,)),
        'norm_g': ones(hidden), 'norm_b': zeros(hidden),
        'emb': w((vocab, hidden), 1.0),      # nn.Embedding(vocab, hidden)
        'pe': positional_encoding(max_len, hidden),
        'vocab_w': w((vocab, hidden)), 'vocab_b': zeros(vocab),
        'layers': layers,
    }


def prepare_params(p, *, nheads, lane=128):
    """One-time preprocessing: transpose matmul weights to [in, out] + cast to
    bf16, split the fused in_proj for cross-attention (Q on target, KV on
    memory), fold the 1/sqrt(D) attention scale into the Q projection weights
    and bias, pre-reshape 1-D vectors to [1, E], pad the vocab head to a
    multiple of 128 lanes."""
    mat = lambda w: jnp.asarray(w, jnp.float32).T.astype(jnp.bfloat16)
    row = lambda v: jnp.asarray(v, jnp.float32).reshape(1, -1)
    e = p['conv_w'].shape[0]
    d = e // nheads
    qscale = 1.0 / math.sqrt(d)
    v = p['vocab_w'].shape[0]
    vpad = ((v + lane - 1) // lane) * lane

    out = {
        'conv_w': mat(p['conv_w']), 'conv_b': row(p['conv_b']),
        'norm_g': row(p['norm_g']), 'norm_b': row(p['norm_b']),
        'emb': p['emb'], 'pe': p['pe'],
        'vocab_w': jnp.pad(mat(p['vocab_w']), ((0, 0), (0, vpad - v))),
        'vocab_b': jnp.pad(row(p['vocab_b']), ((0, 0), (0, vpad - v))),
    }
    # scale only the Q columns of the fused [E, 3E] projection
    qkv_scale = jnp.concatenate(
        [jnp.full((e,), qscale, jnp.float32), jnp.ones((2 * e,), jnp.float32)])
    layers = []
    for lp in p['layers']:
        sa, ca = lp['self_attn'], lp['cross_attn']
        layers.append({
            'sa_qkv_w': (jnp.asarray(sa['in_proj_w'], jnp.float32).T
                         * qkv_scale).astype(jnp.bfloat16),
            'sa_qkv_b': row(sa['in_proj_b']) * qkv_scale,
            'sa_out_w': mat(sa['out_proj_w']), 'sa_out_b': row(sa['out_proj_b']),
            'ca_q_w': (jnp.asarray(ca['in_proj_w'][:e], jnp.float32).T
                       * qscale).astype(jnp.bfloat16),
            'ca_q_b': row(ca['in_proj_b'][:e]) * qscale,
            'ca_kv_w': mat(ca['in_proj_w'][e:]), 'ca_kv_b': row(ca['in_proj_b'][e:]),
            'ca_out_w': mat(ca['out_proj_w']), 'ca_out_b': row(ca['out_proj_b']),
            'ln1_g': row(lp['ln1_g']), 'ln1_b': row(lp['ln1_b']),
            'ln2_g': row(lp['ln2_g']), 'ln2_b': row(lp['ln2_b']),
            'ln3_g': row(lp['ln3_g']), 'ln3_b': row(lp['ln3_b']),
            'w1': mat(lp['w1']), 'b1': row(lp['b1']),
            'w2': mat(lp['w2']), 'b2': row(lp['b2']),
        })
    out['layers'] = layers
    return out


# ----------------------------------- main -----------------------------------

if __name__ == "__main__":
    # Small shapes consistent with the module (real module: C_FEAT = 3072 =
    # CLIP RN50x16 layer4 channels, dim_feedforward = 2048).
    B, C_FEAT, H, W = 2, 128, 4, 4
    HIDDEN, NHEADS, NLAYERS, FFN_DIM = 32, 4, 2, 64
    VOCAB, T = 40, 8

    root = jax.random.PRNGKey(0)
    k_feat, k_trg, k_par = jax.random.split(root, 3)

    feat = jax.random.normal(k_feat, (B, C_FEAT, H, W), jnp.float32)  # backbone output (NCHW)
    trg = jax.random.randint(k_trg, (B, T), 1, VOCAB, dtype=jnp.int32)
    trg = trg.at[0, -2:].set(0)           # some padding; position 0 never padded

    raw = init_params(k_par, c_feat=C_FEAT, hidden=HIDDEN,
                      num_layers=NLAYERS, ffn_dim=FFN_DIM, vocab=VOCAB)
    params = prepare_params(raw, nheads=NHEADS)

    fwd = jax.jit(functools.partial(ocr_forward, nheads=NHEADS, vocab=VOCAB))
    logits = fwd(feat, trg, params)
    jax.block_until_ready(logits)

    assert logits.shape == (B, T, VOCAB), logits.shape
    assert bool(jnp.all(jnp.isfinite(logits)))
    print("KERNEL_OK")
</pallas_src>

<mosaic_0001>
module attributes {stable_mosaic.version = 11 : i64} {
  func.func @_linear_kernel(%arg0: i32, %arg1: memref<16x32xf32, #tpu.memory_space<vmem>>, %arg2: memref<32x96xbf16, #tpu.memory_space<vmem>>, %arg3: memref<1x96xf32, #tpu.memory_space<vmem>>, %arg4: memref<16x96xbf16, #tpu.memory_space<vmem>>) attributes {dimension_semantics = [#tpu.dimension_semantics<parallel>], iteration_bounds = array<i64: 1>, scalar_prefetch = 0 : i64, scratch_operands = 0 : i64, tpu.core_type = #tpu.core_type<tc>, window_params = [{transform_indices = @transform_0, window_bounds = array<i64: 16, 32>}, {pipeline_mode = #tpu.pipeline_mode<synchronous>, transform_indices = @transform_1, window_bounds = array<i64: 32, 96>}, {pipeline_mode = #tpu.pipeline_mode<synchronous>, transform_indices = @transform_2, window_bounds = array<i64: 1, 96>}, {transform_indices = @transform_3, window_bounds = array<i64: 16, 96>}]} {
    %c0 = arith.constant 0 : index
    %c0_0 = arith.constant 0 : index
    %0 = vector.load %arg1[%c0, %c0_0] : memref<16x32xf32, #tpu.memory_space<vmem>>, vector<16x32xf32>
    %1 = arith.truncf %0 : vector<16x32xf32> to vector<16x32xbf16>
    %c0_1 = arith.constant 0 : index
    %c0_2 = arith.constant 0 : index
    %2 = vector.load %arg2[%c0_1, %c0_2] : memref<32x96xbf16, #tpu.memory_space<vmem>>, vector<32x96xbf16>
    %cst = arith.constant dense<0.000000e+00> : vector<16x96xf32>
    %3 = tpu.matmul %1, %2, %cst {dimension_numbers = #tpu.dot_dimension_numbers<[1], [0], [0], [1], [0, 0, 1, 1], [], []>} : vector<16x32xbf16>, vector<32x96xbf16>, vector<16x96xf32> -> vector<16x96xf32>
    %c0_3 = arith.constant 0 : index
    %c0_4 = arith.constant 0 : index
    %4 = vector.load %arg3[%c0_3, %c0_4] : memref<1x96xf32, #tpu.memory_space<vmem>>, vector<1x96xf32>
    %5 = vector.broadcast %4 : vector<1x96xf32> to vector<16x96xf32>
    %6 = arith.addf %3, %5 : vector<16x96xf32>
    %7 = arith.truncf %6 : vector<16x96xf32> to vector<16x96xbf16>
    %c0_5 = arith.constant 0 : index
    %c0_6 = arith.constant 0 : index
    %8 = vector.load %arg4[%c0_5, %c0_6] : memref<16x96xbf16, #tpu.memory_space<vmem>>, vector<16x96xbf16>
    tpu.vector_store %arg4[%c0_5, %c0_6], %7 {strides = array<i32>} : memref<16x96xbf16, #tpu.memory_space<vmem>>, vector<16x96xbf16>,
    return
  }
  func.func @transform_0(%arg0: i32) -> (i32, i32) {
    %c0_i32 = arith.constant 0 : i32
    %c0_i32_0 = arith.constant 0 : i32
    return %arg0, %c0_i32 : i32, i32
  }
  func.func @transform_1(%arg0: i32) -> (i32, i32) {
    %c0_i32 = arith.constant 0 : i32
    %c0_i32_0 = arith.constant 0 : i32
    %c0_i32_1 = arith.constant 0 : i32
    return %c0_i32, %c0_i32_0 : i32, i32
  }
  func.func @transform_2(%arg0: i32) -> (i32, i32) {
    %c0_i32 = arith.constant 0 : i32
    %c0_i32_0 = arith.constant 0 : i32
    %c0_i32_1 = arith.constant 0 : i32
    return %c0_i32, %c0_i32_0 : i32, i32
  }
  func.func @transform_3(%arg0: i32) -> (i32, i32) {
    %c0_i32 = arith.constant 0 : i32
    %c0_i32_0 = arith.constant 0 : i32
    return %arg0, %c0_i32 : i32, i32
  }
}

module attributes {stable_mosaic.version = 11 : i64} {
  func.func @_linear_add_ln_kernel(%arg0: i32, %arg1: memref<16x32xbf16, #tpu.memory_space<vmem>>, %arg2: memref<32x32xbf16, #tpu.memory_space<vmem>>, %arg3: memref<1x32xf32, #tpu.memory_space<vmem>>, %arg4: memref<16x32xf32, #tpu.memory_space<vmem>>, %arg5: memref<1x32xf32, #tpu.memory_space<vmem>>, %arg6: memref<1x32xf32, #tpu.memory_space<vmem>>, %arg7: memref<16x32xf32, #tpu.memory_space<vmem>>) attributes {dimension_semantics = [#tpu.dimension_semantics<parallel>], iteration_bounds = array<i64: 1>, scalar_prefetch = 0 : i64, scratch_operands = 0 : i64, tpu.core_type = #tpu.core_type<tc>, window_params = [{transform_indices = @transform_0, window_bounds = array<i64: 16, 32>}, {pipeline_mode = #tpu.pipeline_mode<synchronous>, transform_indices = @transform_1, window_bounds = array<i64: 32, 32>}, {pipeline_mode = #tpu.pipeline_mode<synchronous>, transform_indices = @transform_2, window_bounds = array<i64: 1, 32>}, {transform_indices = @transform_3, window_bounds = array<i64: 16, 32>}, {pipeline_mode = #tpu.pipeline_mode<synchronous>, transform_indices = @transform_4, window_bounds = array<i64: 1, 32>}, {pipeline_mode = #tpu.pipeline_mode<synchronous>, transform_indices = @transform_5, window_bounds = array<i64: 1, 32>}, {transform_indices = @transform_6, window_bounds = array<i64: 16, 32>}]} {
    %c0 = arith.constant 0 : index
    %c0_0 = arith.constant 0 : index
    %0 = vector.load %arg1[%c0, %c0_0] : memref<16x32xbf16, #tpu.memory_space<vmem>>, vector<16x32xbf16>
    %c0_1 = arith.constant 0 : index
    %c0_2 = arith.constant 0 : index
    %1 = vector.load %arg2[%c0_1, %c0_2] : memref<32x32xbf16, #tpu.memory_space<vmem>>, vector<32x32xbf16>
    %cst = arith.constant dense<0.000000e+00> : vector<16x32xf32>
    %2 = tpu.matmul %0, %1, %cst {dimension_numbers = #tpu.dot_dimension_numbers<[1], [0], [0], [1], [0, 0, 1, 1], [], []>} : vector<16x32xbf16>, vector<32x32xbf16>, vector<16x32xf32> -> vector<16x32xf32>
    %c0_3 = arith.constant 0 : index
    %c0_4 = arith.constant 0 : index
    %3 = vector.load %arg3[%c0_3, %c0_4] : memref<1x32xf32, #tpu.memory_space<vmem>>, vector<1x32xf32>
    %4 = vector.broadcast %3 : vector<1x32xf32> to vector<16x32xf32>
    %5 = arith.addf %2, %4 : vector<16x32xf32>
    %c0_5 = arith.constant 0 : index
    %c0_6 = arith.constant 0 : index
    %6 = vector.load %arg4[%c0_5, %c0_6] : memref<16x32xf32, #tpu.memory_space<vmem>>, vector<16x32xf32>
    %7 = arith.addf %6, %5 : vector<16x32xf32>
    %c0_7 = arith.constant 0 : index
    %c0_8 = arith.constant 0 : index
    %8 = vector.load %arg5[%c0_7, %c0_8] : memref<1x32xf32, #tpu.memory_space<vmem>>, vector<1x32xf32>
    %c0_9 = arith.constant 0 : index
    %c0_10 = arith.constant 0 : index
    %9 = vector.load %arg6[%c0_9, %c0_10] : memref<1x32xf32, #tpu.memory_space<vmem>>, vector<1x32xf32>
    %cst_11 = arith.constant dense<0.000000e+00> : vector<16xf32>
    %10 = vector.multi_reduction <add>, %7, %cst_11 [1] : vector<16x32xf32> to vector<16xf32>
    %11 = vector.shape_cast %10 : vector<16xf32> to vector<16x1xf32>
    %cst_12 = arith.constant 3.200000e+01 : f32
    %12 = vector.broadcast %cst_12 : f32 to vector<16x1xf32>
    %13 = arith.divf %11, %12 : vector<16x1xf32>
    %14 = vector.broadcast %13 : vector<16x1xf32> to vector<16x32xf32>
    %15 = arith.subf %7, %14 : vector<16x32xf32>
    %16 = arith.mulf %15, %15 : vector<16x32xf32>
    %cst_13 = arith.constant dense<0.000000e+00> : vector<16xf32>
    %17 = vector.multi_reduction <add>, %16, %cst_13 [1] : vector<16x32xf32> to vector<16xf32>
    %18 = vector.shape_cast %17 : vector<16xf32> to vector<16x1xf32>
    %cst_14 = arith.constant 3.200000e+01 : f32
    %19 = vector.broadcast %cst_14 : f32 to vector<16x1xf32>
    %20 = arith.divf %18, %19 : vector<16x1xf32>
    %21 = vector.broadcast %13 : vector<16x1xf32> to vector<16x32xf32>
    %22 = arith.subf %7, %21 : vector<16x32xf32>
    %cst_15 = arith.constant 9.99999974E-6 : f32
    %23 = vector.broadcast %cst_15 : f32 to vector<16x1xf32>
    %24 = arith.addf %20, %23 : vector<16x1xf32>
    %25 = math.rsqrt %24 : vector<16x1xf32>
    %26 = vector.broadcast %25 : vector<16x1xf32> to vector<16x32xf32>
    %27 = arith.mulf %22, %26 : vector<16x32xf32>
    %28 = vector.broadcast %8 : vector<1x32xf32> to vector<16x32xf32>
    %29 = arith.mulf %27, %28 : vector<16x32xf32>
    %30 = vector.broadcast %9 : vector<1x32xf32> to vector<16x32xf32>
    %31 = arith.addf %29, %30 : vector<16x32xf32>
    %c0_16 = arith.constant 0 : index
    %c0_17 = arith.constant 0 : index
    %32 = vector.load %arg7[%c0_16, %c0_17] : memref<16x32xf32, #tpu.memory_space<vmem>>, vector<16x32xf32>
    tpu.vector_store %arg7[%c0_16, %c0_17], %31 {strides = array<i32>} : memref<16x32xf32, #tpu.memory_space<vmem>>, vector<16x32xf32>,
    return
  }
  func.func @transform_0(%arg0: i32) -> (i32, i32) {
    %c0_i32 = arith.constant 0 : i32
    %c0_i32_0 = arith.constant 0 : i32
    return %arg0, %c0_i32 : i32, i32
  }
  func.func @transform_1(%arg0: i32) -> (i32, i32) {
    %c0_i32 = arith.constant 0 : i32
    %c0_i32_0 = arith.constant 0 : i32
    %c0_i32_1 = arith.constant 0 : i32
    return %c0_i32, %c0_i32_0 : i32, i32
  }
  func.func @transform_2(%arg0: i32) -> (i32, i32) {
    %c0_i32 = arith.constant 0 : i32
    %c0_i32_0 = arith.constant 0 : i32
    %c0_i32_1 = arith.constant 0 : i32
    return %c0_i32, %c0_i32_0 : i32, i32
  }
  func.func @transform_3(%arg0: i32) -> (i32, i32) {
    %c0_i32 = arith.constant 0 : i32
    %c0_i32_0 = arith.constant 0 : i32
    return %arg0, %c0_i32 : i32, i32
  }
  func.func @transform_4(%arg0: i32) -> (i32, i32) {
    %c0_i32 = arith.constant 0 : i32
    %c0_i32_0 = arith.constant 0 : i32
    %c0_i32_1 = arith.constant 0 : i32
    return %c0_i32, %c0_i32_0 : i32, i32
  }
  func.func @transform_5(%arg0: i32) -> (i32, i32) {
    %c0_i32 = arith.constant 0 : i32
    %c0_i32_0 = arith.constant 0 : i32
    %c0_i32_1 = arith.constant 0 : i32
    return %c0_i32, %c0_i32_0 : i32, i32
  }
  func.func @transform_6(%arg0: i32) -> (i32, i32) {
    %c0_i32 = arith.constant 0 : i32
    %c0_i32_0 = arith.constant 0 : i32
    return %arg0, %c0_i32 : i32, i32
  }
}

module attributes {stable_mosaic.version = 11 : i64} {
  func.func @_linear_kernel(%arg0: i32, %arg1: memref<16x32xf32, #tpu.memory_space<vmem>>, %arg2: memref<32x32xbf16, #tpu.memory_space<vmem>>, %arg3: memref<1x32xf32, #tpu.memory_space<vmem>>, %arg4: memref<16x32xbf16, #tpu.memory_space<vmem>>) attributes {dimension_semantics = [#tpu.dimension_semantics<parallel>], iteration_bounds = array<i64: 1>, scalar_prefetch = 0 : i64, scratch_operands = 0 : i64, tpu.core_type = #tpu.core_type<tc>, window_params = [{transform_indices = @transform_0, window_bounds = array<i64: 16, 32>}, {pipeline_mode = #tpu.pipeline_mode<synchronous>, transform_indices = @transform_1, window_bounds = array<i64: 32, 32>}, {pipeline_mode = #tpu.pipeline_mode<synchronous>, transform_indices = @transform_2, window_bounds = array<i64: 1, 32>}, {transform_indices = @transform_3, window_bounds = array<i64: 16, 32>}]} {
    %c0 = arith.constant 0 : index
    %c0_0 = arith.constant 0 : index
    %0 = vector.load %arg1[%c0, %c0_0] : memref<16x32xf32, #tpu.memory_space<vmem>>, vector<16x32xf32>
    %1 = arith.truncf %0 : vector<16x32xf32> to vector<16x32xbf16>
    %c0_1 = arith.constant 0 : index
    %c0_2 = arith.constant 0 : index
    %2 = vector.load %arg2[%c0_1, %c0_2] : memref<32x32xbf16, #tpu.memory_space<vmem>>, vector<32x32xbf16>
    %cst = arith.constant dense<0.000000e+00> : vector<16x32xf32>
    %3 = tpu.matmul %1, %2, %cst {dimension_numbers = #tpu.dot_dimension_numbers<[1], [0], [0], [1], [0, 0, 1, 1], [], []>} : vector<16x32xbf16>, vector<32x32xbf16>, vector<16x32xf32> -> vector<16x32xf32>
    %c0_3 = arith.constant 0 : index
    %c0_4 = arith.constant 0 : index
    %4 = vector.load %arg3[%c0_3, %c0_4] : memref<1x32xf32, #tpu.memory_space<vmem>>, vector<1x32xf32>
    %5 = vector.broadcast %4 : vector<1x32xf32> to vector<16x32xf32>
    %6 = arith.addf %3, %5 : vector<16x32xf32>
    %7 = arith.truncf %6 : vector<16x32xf32> to vector<16x32xbf16>
    %c0_5 = arith.constant 0 : index
    %c0_6 = arith.constant 0 : index
    %8 = vector.load %arg4[%c0_5, %c0_6] : memref<16x32xbf16, #tpu.memory_space<vmem>>, vector<16x32xbf16>
    tpu.vector_store %arg4[%c0_5, %c0_6], %7 {strides = array<i32>} : memref<16x32xbf16, #tpu.memory_space<vmem>>, vector<16x32xbf16>,
    return
  }
  func.func @transform_0(%arg0: i32) -> (i32, i32) {
    %c0_i32 = arith.constant 0 : i32
    %c0_i32_0 = arith.constant 0 : i32
    return %arg0, %c0_i32 : i32, i32
  }
  func.func @transform_1(%arg0: i32) -> (i32, i32) {
    %c0_i32 = arith.constant 0 : i32
    %c0_i32_0 = arith.constant 0 : i32
    %c0_i32_1 = arith.constant 0 : i32
    return %c0_i32, %c0_i32_0 : i32, i32
  }
  func.func @transform_2(%arg0: i32) -> (i32, i32) {
    %c0_i32 = arith.constant 0 : i32
    %c0_i32_0 = arith.constant 0 : i32
    %c0_i32_1 = arith.constant 0 : i32
    return %c0_i32, %c0_i32_0 : i32, i32
  }
  func.func @transform_3(%arg0: i32) -> (i32, i32) {
    %c0_i32 = arith.constant 0 : i32
    %c0_i32_0 = arith.constant 0 : i32
    return %arg0, %c0_i32 : i32, i32
  }
}

module attributes {stable_mosaic.version = 11 : i64} {
  func.func @_self_attn_kernel(%arg0: i32, %arg1: memref<1x8x96xbf16, #tpu.memory_space<vmem>>, %arg2: memref<1x1x8xf32, #tpu.memory_space<vmem>>, %arg3: memref<1x8x32xbf16, #tpu.memory_space<vmem>>) attributes {dimension_semantics = [#tpu.dimension_semantics<parallel>], iteration_bounds = array<i64: 2>, scalar_prefetch = 0 : i64, scratch_operands = 0 : i64, tpu.core_type = #tpu.core_type<tc>, window_params = [{transform_indices = @transform_0, window_bounds = array<i64: 1, 8, 96>}, {transform_indices = @transform_1, window_bounds = array<i64: 1, 1, 8>}, {transform_indices = @transform_2, window_bounds = array<i64: 1, 8, 32>}]} {
    %c0 = arith.constant 0 : index
    %c0_0 = arith.constant 0 : index
    %c0_1 = arith.constant 0 : index
    %0 = vector.load %arg1[%c0, %c0_0, %c0_1] : memref<1x8x96xbf16, #tpu.memory_space<vmem>>, vector<1x8x96xbf16>
    %1 = vector.shape_cast %0 : vector<1x8x96xbf16> to vector<8x96xbf16>
    %2 = tpu.iota {dimensions = array<i32: 0>} : vector<8x8xi32>
    %3 = tpu.iota {dimensions = array<i32: 1>} : vector<8x8xi32>
    %4 = arith.cmpi sgt, %3, %2 : vector<8x8xi32>
    %cst = arith.constant -1.000000e+30 : f32
    %cst_2 = arith.constant 0.000000e+00 : f32
    %5 = vector.broadcast %cst : f32 to vector<8x8xf32>
    %6 = vector.broadcast %cst_2 : f32 to vector<8x8xf32>
    %7 = arith.select %4, %5, %6 : vector<8x8xi1>, vector<8x8xf32>
    %c0_3 = arith.constant 0 : index
    %c0_4 = arith.constant 0 : index
    %c0_5 = arith.constant 0 : index
    %8 = vector.load %arg2[%c0_3, %c0_4, %c0_5] : memref<1x1x8xf32, #tpu.memory_space<vmem>>, vector<1x1x8xf32>
    %9 = vector.shape_cast %8 : vector<1x1x8xf32> to vector<1x8xf32>
    %10 = vector.broadcast %9 : vector<1x8xf32> to vector<8x8xf32>
    %11 = arith.addf %7, %10 : vector<8x8xf32>
    %12 = vector.extract_strided_slice %1 {offsets = [0, 0], sizes = [8, 32], strides = [1, 1]} : vector<8x96xbf16> to vector<8x32xbf16>
    %13 = vector.extract_strided_slice %1 {offsets = [0, 32], sizes = [8, 32], strides = [1, 1]} : vector<8x96xbf16> to vector<8x32xbf16>
    %14 = vector.extract_strided_slice %1 {offsets = [0, 64], sizes = [8, 32], strides = [1, 1]} : vector<8x96xbf16> to vector<8x32xbf16>
    %15 = vector.extract_strided_slice %12 {offsets = [0, 0], sizes = [8, 8], strides = [1, 1]} : vector<8x32xbf16> to vector<8x8xbf16>
    %16 = vector.extract_strided_slice %13 {offsets = [0, 0], sizes = [8, 8], strides = [1, 1]} : vector<8x32xbf16> to vector<8x8xbf16>
    %17 = tpu.transpose %16, [1, 0] : vector<8x8xbf16> -> vector<8x8xbf16>
    %cst_6 = arith.constant dense<0.000000e+00> : vector<8x8xf32>
    %18 = tpu.matmul %15, %17, %cst_6 {dimension_numbers = #tpu.dot_dimension_numbers<[1], [0], [0], [1], [0, 0, 1, 1], [], []>} : vector<8x8xbf16>, vector<8x8xbf16>, vector<8x8xf32> -> vector<8x8xf32>
    %19 = arith.addf %18, %11 : vector<8x8xf32>
    %20 = vector.extract_strided_slice %14 {offsets = [0, 0], sizes = [8, 8], strides = [1, 1]} : vector<8x32xbf16> to vector<8x8xbf16>
    %cst_7 = arith.constant dense<0xFF800000> : vector<8xf32>
    %21 = vector.multi_reduction <maximumf>, %19, %cst_7 [1] : vector<8x8xf32> to vector<8xf32>
    %22 = vector.shape_cast %21 : vector<8xf32> to vector<8x1xf32>
    %23 = vector.broadcast %22 : vector<8x1xf32> to vector<8x8xf32>
    %24 = arith.subf %19, %23 : vector<8x8xf32>
    %25 = math.exp %24 : vector<8x8xf32>
    %cst_8 = arith.constant dense<0.000000e+00> : vector<8xf32>
    %26 = vector.multi_reduction <add>, %25, %cst_8 [1] : vector<8x8xf32> to vector<8xf32>
    %27 = vector.shape_cast %26 : vector<8xf32> to vector<8x1xf32>
    %28 = tpu.reciprocal %27 {approx = true} : vector<8x1xf32> -> vector<8x1xf32>
    %29 = vector.broadcast %28 : vector<8x1xf32> to vector<8x8xf32>
    %30 = arith.mulf %25, %29 : vector<8x8xf32>
    %31 = arith.truncf %30 : vector<8x8xf32> to vector<8x8xbf16>
    %cst_9 = arith.constant dense<0.000000e+00> : vector<8x8xf32>
    %32 = tpu.matmul %31, %20, %cst_9 {dimension_numbers = #tpu.dot_dimension_numbers<[1], [0], [0], [1], [0, 0, 1, 1], [], []>} : vector<8x8xbf16>, vector<8x8xbf16>, vector<8x8xf32> -> vector<8x8xf32>
    %33 = arith.truncf %32 : vector<8x8xf32> to vector<8x8xbf16>
    %c0_10 = arith.constant 0 : index
    %c0_11 = arith.constant 0 : index
    %c0_12 = arith.constant 0 : index
    %34 = vector.load %arg3[%c0_10, %c0_11, %c0_12] : memref<1x8x32xbf16, #tpu.memory_space<vmem>>, vector<1x8x8xbf16>
    %35 = vector.shape_cast %34 : vector<1x8x8xbf16> to vector<8x8xbf16>
    %36 = vector.shape_cast %33 : vector<8x8xbf16> to vector<1x8x8xbf16>
    tpu.vector_store %arg3[%c0_10, %c0_11, %c0_12], %36 {strides = array<i32>} : memref<1x8x32xbf16, #tpu.memory_space<vmem>>, vector<1x8x8xbf16>,
    %37 = vector.extract_strided_slice %12 {offsets = [0, 8], sizes = [8, 8], strides = [1, 1]} : vector<8x32xbf16> to vector<8x8xbf16>
    %38 = vector.extract_strided_slice %13 {offsets = [0, 8], sizes = [8, 8], strides = [1, 1]} : vector<8x32xbf16> to vector<8x8xbf16>
    %39 = tpu.transpose %38, [1, 0] : vector<8x8xbf16> -> vector<8x8xbf16>
    %cst_13 = arith.constant dense<0.000000e+00> : vector<8x8xf32>
    %40 = tpu.matmul %37, %39, %cst_13 {dimension_numbers = #tpu.dot_dimension_numbers<[1], [0], [0], [1], [0, 0, 1, 1], [], []>} : vector<8x8xbf16>, vector<8x8xbf16>, vector<8x8xf32> -> vector<8x8xf32>
    %41 = arith.addf %40, %11 : vector<8x8xf32>
    %42 = vector.extract_strided_slice %14 {offsets = [0, 8], sizes = [8, 8], strides = [1, 1]} : vector<8x32xbf16> to vector<8x8xbf16>
    %cst_14 = arith.constant dense<0xFF800000> : vector<8xf32>
    %43 = vector.multi_reduction <maximumf>, %41, %cst_14 [1] : vector<8x8xf32> to vector<8xf32>
    %44 = vector.shape_cast %43 : vector<8xf32> to vector<8x1xf32>
    %45 = vector.broadcast %44 : vector<8x1xf32> to vector<8x8xf32>
    %46 = arith.subf %41, %45 : vector<8x8xf32>
    %47 = math.exp %46 : vector<8x8xf32>
    %cst_15 = arith.constant dense<0.000000e+00> : vector<8xf32>
    %48 = vector.multi_reduction <add>, %47, %cst_15 [1] : vector<8x8xf32> to vector<8xf32>
    %49 = vector.shape_cast %48 : vector<8xf32> to vector<8x1xf32>
    %50 = tpu.reciprocal %49 {approx = true} : vector<8x1xf32> -> vector<8x1xf32>
    %51 = vector.broadcast %50 : vector<8x1xf32> to vector<8x8xf32>
    %52 = arith.mulf %47, %51 : vector<8x8xf32>
    %53 = arith.truncf %52 : vector<8x8xf32> to vector<8x8xbf16>
    %cst_16 = arith.constant dense<0.000000e+00> : vector<8x8xf32>
    %54 = tpu.matmul %53, %42, %cst_16 {dimension_numbers = #tpu.dot_dimension_numbers<[1], [0], [0], [1], [0, 0, 1, 1], [], []>} : vector<8x8xbf16>, vector<8x8xbf16>, vector<8x8xf32> -> vector<8x8xf32>
    %55 = arith.truncf %54 : vector<8x8xf32> to vector<8x8xbf16>
    %c0_17 = arith.constant 0 : index
    %c0_18 = arith.constant 0 : index
    %c8 = arith.constant 8 : index
    %56 = vector.load %arg3[%c0_17, %c0_18, %c8] : memref<1x8x32xbf16, #tpu.memory_space<vmem>>, vector<1x8x8xbf16>
    %57 = vector.shape_cast %56 : vector<1x8x8xbf16> to vector<8x8xbf16>
    %58 = vector.shape_cast %55 : vector<8x8xbf16> to vector<1x8x8xbf16>
    tpu.vector_store %arg3[%c0_17, %c0_18, %c8], %58 {strides = array<i32>} : memref<1x8x32xbf16, #tpu.memory_space<vmem>>, vector<1x8x8xbf16>,
    %59 = vector.extract_strided_slice %12 {offsets = [0, 16], sizes = [8, 8], strides = [1, 1]} : vector<8x32xbf16> to vector<8x8xbf16>
    %60 = vector.extract_strided_slice %13 {offsets = [0, 16], sizes = [8, 8], strides = [1, 1]} : vector<8x32xbf16> to vector<8x8xbf16>
    %61 = tpu.transpose %60, [1, 0] : vector<8x8xbf16> -> vector<8x8xbf16>
    %cst_19 = arith.constant dense<0.000000e+00> : vector<8x8xf32>
    %62 = tpu.matmul %59, %61, %cst_19 {dimension_numbers = #tpu.dot_dimension_numbers<[1], [0], [0], [1], [0, 0, 1, 1], [], []>} : vector<8x8xbf16>, vector<8x8xbf16>, vector<8x8xf32> -> vector<8x8xf32>
    %63 = arith.addf %62, %11 : vector<8x8xf32>
    %64 = vector.extract_strided_slice %14 {offsets = [0, 16], sizes = [8, 8], strides = [1, 1]} : vector<8x32xbf16> to vector<8x8xbf16>
    %cst_20 = arith.constant dense<0xFF800000> : vector<8xf32>
    %65 = vector.multi_reduction <maximumf>, %63, %cst_20 [1] : vector<8x8xf32> to vector<8xf32>
    %66 = vector.shape_cast %65 : vector<8xf32> to vector<8x1xf32>
    %67 = vector.broadcast %66 : vector<8x1xf32> to vector<8x8xf32>
    %68 = arith.subf %63, %67 : vector<8x8xf32>
    %69 = math.exp %68 : vector<8x8xf32>
    %cst_21 = arith.constant dense<0.000000e+00> : vector<8xf32>
    %70 = vector.multi_reduction <add>, %69, %cst_21 [1] : vector<8x8xf32> to vector<8xf32>
    %71 = vector.shape_cast %70 : vector<8xf32> to vector<8x1xf32>
    %72 = tpu.reciprocal %71 {approx = true} : vector<8x1xf32> -> vector<8x1xf32>
    %73 = vector.broadcast %72 : vector<8x1xf32> to vector<8x8xf32>
    %74 = arith.mulf %69, %73 : vector<8x8xf32>
    %75 = arith.truncf %74 : vector<8x8xf32> to vector<8x8xbf16>
    %cst_22 = arith.constant dense<0.000000e+00> : vector<8x8xf32>
    %76 = tpu.matmul %75, %64, %cst_22 {dimension_numbers = #tpu.dot_dimension_numbers<[1], [0], [0], [1], [0, 0, 1, 1], [], []>} : vector<8x8xbf16>, vector<8x8xbf16>, vector<8x8xf32> -> vector<8x8xf32>
    %77 = arith.truncf %76 : vector<8x8xf32> to vector<8x8xbf16>
    %c0_23 = arith.constant 0 : index
    %c0_24 = arith.constant 0 : index
    %c16 = arith.constant 16 : index
    %78 = vector.load %arg3[%c0_23, %c0_24, %c16] : memref<1x8x32xbf16, #tpu.memory_space<vmem>>, vector<1x8x8xbf16>
    %79 = vector.shape_cast %78 : vector<1x8x8xbf16> to vector<8x8xbf16>
    %80 = vector.shape_cast %77 : vector<8x8xbf16> to vector<1x8x8xbf16>
    tpu.vector_store %arg3[%c0_23, %c0_24, %c16], %80 {strides = array<i32>} : memref<1x8x32xbf16, #tpu.memory_space<vmem>>, vector<1x8x8xbf16>,
    %81 = vector.extract_strided_slice %12 {offsets = [0, 24], sizes = [8, 8], strides = [1, 1]} : vector<8x32xbf16> to vector<8x8xbf16>
    %82 = vector.extract_strided_slice %13 {offsets = [0, 24], sizes = [8, 8], strides = [1, 1]} : vector<8x32xbf16> to vector<8x8xbf16>
    %83 = tpu.transpose %82, [1, 0] : vector<8x8xbf16> -> vector<8x8xbf16>
    %cst_25 = arith.constant dense<0.000000e+00> : vector<8x8xf32>
    %84 = tpu.matmul %81, %83, %cst_25 {dimension_numbers = #tpu.dot_dimension_numbers<[1], [0], [0], [1], [0, 0, 1, 1], [], []>} : vector<8x8xbf16>, vector<8x8xbf16>, vector<8x8xf32> -> vector<8x8xf32>
    %85 = arith.addf %84, %11 : vector<8x8xf32>
    %86 = vector.extract_strided_slice %14 {offsets = [0, 24], sizes = [8, 8], strides = [1, 1]} : vector<8x32xbf16> to vector<8x8xbf16>
    %cst_26 = arith.constant dense<0xFF800000> : vector<8xf32>
    %87 = vector.multi_reduction <maximumf>, %85, %cst_26 [1] : vector<8x8xf32> to vector<8xf32>
    %88 = vector.shape_cast %87 : vector<8xf32> to vector<8x1xf32>
    %89 = vector.broadcast %88 : vector<8x1xf32> to vector<8x8xf32>
    %90 = arith.subf %85, %89 : vector<8x8xf32>
    %91 = math.exp %90 : vector<8x8xf32>
    %cst_27 = arith.constant dense<0.000000e+00> : vector<8xf32>
    %92 = vector.multi_reduction <add>, %91, %cst_27 [1] : vector<8x8xf32> to vector<8xf32>
    %93 = vector.shape_cast %92 : vector<8xf32> to vector<8x1xf32>
    %94 = tpu.reciprocal %93 {approx = true} : vector<8x1xf32> -> vector<8x1xf32>
    %95 = vector.broadcast %94 : vector<8x1xf32> to vector<8x8xf32>
    %96 = arith.mulf %91, %95 : vector<8x8xf32>
    %97 = arith.truncf %96 : vector<8x8xf32> to vector<8x8xbf16>
    %cst_28 = arith.constant dense<0.000000e+00> : vector<8x8xf32>
    %98 = tpu.matmul %97, %86, %cst_28 {dimension_numbers = #tpu.dot_dimension_numbers<[1], [0], [0], [1], [0, 0, 1, 1], [], []>} : vector<8x8xbf16>, vector<8x8xbf16>, vector<8x8xf32> -> vector<8x8xf32>
    %99 = arith.truncf %98 : vector<8x8xf32> to vector<8x8xbf16>
    %c0_29 = arith.constant 0 : index
    %c0_30 = arith.constant 0 : index
    %c24 = arith.constant 24 : index
    %100 = vector.load %arg3[%c0_29, %c0_30, %c24] : memref<1x8x32xbf16, #tpu.memory_space<vmem>>, vector<1x8x8xbf16>
    %101 = vector.shape_cast %100 : vector<1x8x8xbf16> to vector<8x8xbf16>
    %102 = vector.shape_cast %99 : vector<8x8xbf16> to vector<1x8x8xbf16>
    tpu.vector_store %arg3[%c0_29, %c0_30, %c24], %102 {strides = array<i32>} : memref<1x8x32xbf16, #tpu.memory_space<vmem>>, vector<1x8x8xbf16>,
    return
  }
  func.func @transform_0(%arg0: i32) -> (i32, i32, i32) {
    %c0_i32 = arith.constant 0 : i32
    %c0_i32_0 = arith.constant 0 : i32
    %c0_i32_1 = arith.constant 0 : i32
    return %arg0, %c0_i32, %c0_i32_0 : i32, i32, i32
  }
  func.func @transform_1(%arg0: i32) -> (i32, i32, i32) {
    %c0_i32 = arith.constant 0 : i32
    %c0_i32_0 = arith.constant 0 : i32
    %c0_i32_1 = arith.constant 0 : i32
    return %arg0, %c0_i32, %c0_i32_0 : i32, i32, i32
  }
  func.func @transform_2(%arg0: i32) -> (i32, i32, i32) {
    %c0_i32 = arith.constant 0 : i32
    %c0_i32_0 = arith.constant 0 : i32
    %c0_i32_1 = arith.constant 0 : i32
    return %arg0, %c0_i32, %c0_i32_0 : i32, i32, i32
  }
}

module attributes {stable_mosaic.version = 11 : i64} {
  func.func @_linear_kernel(%arg0: i32, %arg1: memref<32x32xbf16, #tpu.memory_space<vmem>>, %arg2: memref<32x64xbf16, #tpu.memory_space<vmem>>, %arg3: memref<1x64xf32, #tpu.memory_space<vmem>>, %arg4: memref<32x64xbf16, #tpu.memory_space<vmem>>) attributes {dimension_semantics = [#tpu.dimension_semantics<parallel>], iteration_bounds = array<i64: 1>, scalar_prefetch = 0 : i64, scratch_operands = 0 : i64, tpu.core_type = #tpu.core_type<tc>, window_params = [{transform_indices = @transform_0, window_bounds = array<i64: 32, 32>}, {pipeline_mode = #tpu.pipeline_mode<synchronous>, transform_indices = @transform_1, window_bounds = array<i64: 32, 64>}, {pipeline_mode = #tpu.pipeline_mode<synchronous>, transform_indices = @transform_2, window_bounds = array<i64: 1, 64>}, {transform_indices = @transform_3, window_bounds = array<i64: 32, 64>}]} {
    %c0 = arith.constant 0 : index
    %c0_0 = arith.constant 0 : index
    %0 = vector.load %arg1[%c0, %c0_0] : memref<32x32xbf16, #tpu.memory_space<vmem>>, vector<32x32xbf16>
    %c0_1 = arith.constant 0 : index
    %c0_2 = arith.constant 0 : index
    %1 = vector.load %arg2[%c0_1, %c0_2] : memref<32x64xbf16, #tpu.memory_space<vmem>>, vector<32x64xbf16>
    %cst = arith.constant dense<0.000000e+00> : vector<32x64xf32>
    %2 = tpu.matmul %0, %1, %cst {dimension_numbers = #tpu.dot_dimension_numbers<[1], [0], [0], [1], [0, 0, 1, 1], [], []>} : vector<32x32xbf16>, vector<32x64xbf16>, vector<32x64xf32> -> vector<32x64xf32>
    %c0_3 = arith.constant 0 : index
    %c0_4 = arith.constant 0 : index
    %3 = vector.load %arg3[%c0_3, %c0_4] : memref<1x64xf32, #tpu.memory_space<vmem>>, vector<1x64xf32>
    %4 = vector.broadcast %3 : vector<1x64xf32> to vector<32x64xf32>
    %5 = arith.addf %2, %4 : vector<32x64xf32>
    %6 = arith.truncf %5 : vector<32x64xf32> to vector<32x64xbf16>
    %c0_5 = arith.constant 0 : index
    %c0_6 = arith.constant 0 : index
    %7 = vector.load %arg4[%c0_5, %c0_6] : memref<32x64xbf16, #tpu.memory_space<vmem>>, vector<32x64xbf16>
    tpu.vector_store %arg4[%c0_5, %c0_6], %6 {strides = array<i32>} : memref<32x64xbf16, #tpu.memory_space<vmem>>, vector<32x64xbf16>,
    return
  }
  func.func @transform_0(%arg0: i32) -> (i32, i32) {
    %c0_i32 = arith.constant 0 : i32
    %c0_i32_0 = arith.constant 0 : i32
    return %arg0, %c0_i32 : i32, i32
  }
  func.func @transform_1(%arg0: i32) -> (i32, i32) {
    %c0_i32 = arith.constant 0 : i32
    %c0_i32_0 = arith.constant 0 : i32
    %c0_i32_1 = arith.constant 0 : i32
    return %c0_i32, %c0_i32_0 : i32, i32
  }
  func.func @transform_2(%arg0: i32) -> (i32, i32) {
    %c0_i32 = arith.constant 0 : i32
    %c0_i32_0 = arith.constant 0 : i32
    %c0_i32_1 = arith.constant 0 : i32
    return %c0_i32, %c0_i32_0 : i32, i32
  }
  func.func @transform_3(%arg0: i32) -> (i32, i32) {
    %c0_i32 = arith.constant 0 : i32
    %c0_i32_0 = arith.constant 0 : i32
    return %arg0, %c0_i32 : i32, i32
  }
}

module attributes {stable_mosaic.version = 11 : i64} {
  func.func @_conv_gelu_ln_kernel(%arg0: i32, %arg1: memref<32x128xf32, #tpu.memory_space<vmem>>, %arg2: memref<128x32xbf16, #tpu.memory_space<vmem>>, %arg3: memref<1x32xf32, #tpu.memory_space<vmem>>, %arg4: memref<1x32xf32, #tpu.memory_space<vmem>>, %arg5: memref<1x32xf32, #tpu.memory_space<vmem>>, %arg6: memref<32x32xbf16, #tpu.memory_space<vmem>>) attributes {dimension_semantics = [#tpu.dimension_semantics<parallel>], iteration_bounds = array<i64: 1>, scalar_prefetch = 0 : i64, scratch_operands = 0 : i64, tpu.core_type = #tpu.core_type<tc>, window_params = [{transform_indices = @transform_0, window_bounds = array<i64: 32, 128>}, {pipeline_mode = #tpu.pipeline_mode<synchronous>, transform_indices = @transform_1, window_bounds = array<i64: 128, 32>}, {pipeline_mode = #tpu.pipeline_mode<synchronous>, transform_indices = @transform_2, window_bounds = array<i64: 1, 32>}, {pipeline_mode = #tpu.pipeline_mode<synchronous>, transform_indices = @transform_3, window_bounds = array<i64: 1, 32>}, {pipeline_mode = #tpu.pipeline_mode<synchronous>, transform_indices = @transform_4, window_bounds = array<i64: 1, 32>}, {transform_indices = @transform_5, window_bounds = array<i64: 32, 32>}]} {
    %c0 = arith.constant 0 : index
    %c0_0 = arith.constant 0 : index
    %0 = vector.load %arg1[%c0, %c0_0] : memref<32x128xf32, #tpu.memory_space<vmem>>, vector<32x128xf32>
    %1 = arith.truncf %0 : vector<32x128xf32> to vector<32x128xbf16>
    %c0_1 = arith.constant 0 : index
    %c0_2 = arith.constant 0 : index
    %2 = vector.load %arg2[%c0_1, %c0_2] : memref<128x32xbf16, #tpu.memory_space<vmem>>, vector<128x32xbf16>
    %cst = arith.constant dense<0.000000e+00> : vector<32x32xf32>
    %3 = tpu.matmul %1, %2, %cst {dimension_numbers = #tpu.dot_dimension_numbers<[1], [0], [0], [1], [0, 0, 1, 1], [], []>} : vector<32x128xbf16>, vector<128x32xbf16>, vector<32x32xf32> -> vector<32x32xf32>
    %c0_3 = arith.constant 0 : index
    %c0_4 = arith.constant 0 : index
    %4 = vector.load %arg3[%c0_3, %c0_4] : memref<1x32xf32, #tpu.memory_space<vmem>>, vector<1x32xf32>
    %5 = vector.broadcast %4 : vector<1x32xf32> to vector<32x32xf32>
    %6 = arith.addf %3, %5 : vector<32x32xf32>
    %cst_5 = arith.constant 5.000000e-01 : f32
    %7 = vector.broadcast %cst_5 : f32 to vector<32x32xf32>
    %8 = arith.mulf %7, %6 : vector<32x32xf32>
    %cst_6 = arith.constant 4.471500e-02 : f32
    %9 = vector.broadcast %cst_6 : f32 to vector<32x32xf32>
    %10 = arith.mulf %9, %6 : vector<32x32xf32>
    %11 = arith.mulf %10, %6 : vector<32x32xf32>
    %12 = arith.mulf %11, %6 : vector<32x32xf32>
    %13 = arith.addf %6, %12 : vector<32x32xf32>
    %cst_7 = arith.constant 0.797884583 : f32
    %14 = vector.broadcast %cst_7 : f32 to vector<32x32xf32>
    %15 = arith.mulf %14, %13 : vector<32x32xf32>
    %16 = math.tanh %15 : vector<32x32xf32>
    %cst_8 = arith.constant 1.000000e+00 : f32
    %17 = vector.broadcast %cst_8 : f32 to vector<32x32xf32>
    %18 = arith.addf %17, %16 : vector<32x32xf32>
    %19 = arith.mulf %8, %18 : vector<32x32xf32>
    %c0_9 = arith.constant 0 : index
    %c0_10 = arith.constant 0 : index
    %20 = vector.load %arg4[%c0_9, %c0_10] : memref<1x32xf32, #tpu.memory_space<vmem>>, vector<1x32xf32>
    %c0_11 = arith.constant 0 : index
    %c0_12 = arith.constant 0 : index
    %21 = vector.load %arg5[%c0_11, %c0_12] : memref<1x32xf32, #tpu.memory_space<vmem>>, vector<1x32xf32>
    %cst_13 = arith.constant dense<0.000000e+00> : vector<32xf32>
    %22 = vector.multi_reduction <add>, %19, %cst_13 [1] : vector<32x32xf32> to vector<32xf32>
    %23 = vector.shape_cast %22 : vector<32xf32> to vector<32x1xf32>
    %cst_14 = arith.constant 3.200000e+01 : f32
    %24 = vector.broadcast %cst_14 : f32 to vector<32x1xf32>
    %25 = arith.divf %23, %24 : vector<32x1xf32>
    %26 = vector.broadcast %25 : vector<32x1xf32> to vector<32x32xf32>
    %27 = arith.subf %19, %26 : vector<32x32xf32>
    %28 = arith.mulf %27, %27 : vector<32x32xf32>
    %cst_15 = arith.constant dense<0.000000e+00> : vector<32xf32>
    %29 = vector.multi_reduction <add>, %28, %cst_15 [1] : vector<32x32xf32> to vector<32xf32>
    %30 = vector.shape_cast %29 : vector<32xf32> to vector<32x1xf32>
    %cst_16 = arith.constant 3.200000e+01 : f32
    %31 = vector.broadcast %cst_16 : f32 to vector<32x1xf32>
    %32 = arith.divf %30, %31 : vector<32x1xf32>
    %33 = vector.broadcast %25 : vector<32x1xf32> to vector<32x32xf32>
    %34 = arith.subf %19, %33 : vector<32x32xf32>
    %cst_17 = arith.constant 9.99999974E-6 : f32
    %35 = vector.broadcast %cst_17 : f32 to vector<32x1xf32>
    %36 = arith.addf %32, %35 : vector<32x1xf32>
    %37 = math.rsqrt %36 : vector<32x1xf32>
    %38 = vector.broadcast %37 : vector<32x1xf32> to vector<32x32xf32>
    %39 = arith.mulf %34, %38 : vector<32x32xf32>
    %40 = vector.broadcast %20 : vector<1x32xf32> to vector<32x32xf32>
    %41 = arith.mulf %39, %40 : vector<32x32xf32>
    %42 = vector.broadcast %21 : vector<1x32xf32> to vector<32x32xf32>
    %43 = arith.addf %41, %42 : vector<32x32xf32>
    %44 = arith.truncf %43 : vector<32x32xf32> to vector<32x32xbf16>
    %c0_18 = arith.constant 0 : index
    %c0_19 = arith.constant 0 : index
    %45 = vector.load %arg6[%c0_18, %c0_19] : memref<32x32xbf16, #tpu.memory_space<vmem>>, vector<32x32xbf16>
    tpu.vector_store %arg6[%c0_18, %c0_19], %44 {strides = array<i32>} : memref<32x32xbf16, #tpu.memory_space<vmem>>, vector<32x32xbf16>,
    return
  }
  func.func @transform_0(%arg0: i32) -> (i32, i32) {
    %c0_i32 = arith.constant 0 : i32
    %c0_i32_0 = arith.constant 0 : i32
    return %arg0, %c0_i32 : i32, i32
  }
  func.func @transform_1(%arg0: i32) -> (i32, i32) {
    %c0_i32 = arith.constant 0 : i32
    %c0_i32_0 = arith.constant 0 : i32
    %c0_i32_1 = arith.constant 0 : i32
    return %c0_i32, %c0_i32_0 : i32, i32
  }
  func.func @transform_2(%arg0: i32) -> (i32, i32) {
    %c0_i32 = arith.constant 0 : i32
    %c0_i32_0 = arith.constant 0 : i32
    %c0_i32_1 = arith.constant 0 : i32
    return %c0_i32, %c0_i32_0 : i32, i32
  }
  func.func @transform_3(%arg0: i32) -> (i32, i32) {
    %c0_i32 = arith.constant 0 : i32
    %c0_i32_0 = arith.constant 0 : i32
    %c0_i32_1 = arith.constant 0 : i32
    return %c0_i32, %c0_i32_0 : i32, i32
  }
  func.func @transform_4(%arg0: i32) -> (i32, i32) {
    %c0_i32 = arith.constant 0 : i32
    %c0_i32_0 = arith.constant 0 : i32
    %c0_i32_1 = arith.constant 0 : i32
    return %c0_i32, %c0_i32_0 : i32, i32
  }
  func.func @transform_5(%arg0: i32) -> (i32, i32) {
    %c0_i32 = arith.constant 0 : i32
    %c0_i32_0 = arith.constant 0 : i32
    return %arg0, %c0_i32 : i32, i32
  }
}

module attributes {stable_mosaic.version = 11 : i64} {
  func.func @_cross_attn_kernel(%arg0: i32, %arg1: memref<1x8x32xbf16, #tpu.memory_space<vmem>>, %arg2: memref<1x16x64xbf16, #tpu.memory_space<vmem>>, %arg3: memref<1x8x32xbf16, #tpu.memory_space<vmem>>) attributes {dimension_semantics = [#tpu.dimension_semantics<parallel>], iteration_bounds = array<i64: 2>, scalar_prefetch = 0 : i64, scratch_operands = 0 : i64, tpu.core_type = #tpu.core_type<tc>, window_params = [{transform_indices = @transform_0, window_bounds = array<i64: 1, 8, 32>}, {transform_indices = @transform_1, window_bounds = array<i64: 1, 16, 64>}, {transform_indices = @transform_2, window_bounds = array<i64: 1, 8, 32>}]} {
    %c0 = arith.constant 0 : index
    %c0_0 = arith.constant 0 : index
    %c0_1 = arith.constant 0 : index
    %0 = vector.load %arg2[%c0, %c0_0, %c0_1] : memref<1x16x64xbf16, #tpu.memory_space<vmem>>, vector<1x16x64xbf16>
    %1 = vector.shape_cast %0 : vector<1x16x64xbf16> to vector<16x64xbf16>
    %c0_2 = arith.constant 0 : index
    %c0_3 = arith.constant 0 : index
    %c0_4 = arith.constant 0 : index
    %2 = vector.load %arg1[%c0_2, %c0_3, %c0_4] : memref<1x8x32xbf16, #tpu.memory_space<vmem>>, vector<1x8x32xbf16>
    %3 = vector.shape_cast %2 : vector<1x8x32xbf16> to vector<8x32xbf16>
    %4 = vector.extract_strided_slice %1 {offsets = [0, 0], sizes = [16, 32], strides = [1, 1]} : vector<16x64xbf16> to vector<16x32xbf16>
    %5 = vector.extract_strided_slice %1 {offsets = [0, 32], sizes = [16, 32], strides = [1, 1]} : vector<16x64xbf16> to vector<16x32xbf16>
    %6 = vector.extract_strided_slice %3 {offsets = [0, 0], sizes = [8, 8], strides = [1, 1]} : vector<8x32xbf16> to vector<8x8xbf16>
    %7 = vector.extract_strided_slice %4 {offsets = [0, 0], sizes = [16, 8], strides = [1, 1]} : vector<16x32xbf16> to vector<16x8xbf16>
    %8 = tpu.transpose %7, [1, 0] : vector<16x8xbf16> -> vector<8x16xbf16>
    %cst = arith.constant dense<0.000000e+00> : vector<8x16xf32>
    %9 = tpu.matmul %6, %8, %cst {dimension_numbers = #tpu.dot_dimension_numbers<[1], [0], [0], [1], [0, 0, 1, 1], [], []>} : vector<8x8xbf16>, vector<8x16xbf16>, vector<8x16xf32> -> vector<8x16xf32>
    %10 = vector.extract_strided_slice %5 {offsets = [0, 0], sizes = [16, 8], strides = [1, 1]} : vector<16x32xbf16> to vector<16x8xbf16>
    %cst_5 = arith.constant dense<0xFF800000> : vector<8xf32>
    %11 = vector.multi_reduction <maximumf>, %9, %cst_5 [1] : vector<8x16xf32> to vector<8xf32>
    %12 = vector.shape_cast %11 : vector<8xf32> to vector<8x1xf32>
    %13 = vector.broadcast %12 : vector<8x1xf32> to vector<8x16xf32>
    %14 = arith.subf %9, %13 : vector<8x16xf32>
    %15 = math.exp %14 : vector<8x16xf32>
    %cst_6 = arith.constant dense<0.000000e+00> : vector<8xf32>
    %16 = vector.multi_reduction <add>, %15, %cst_6 [1] : vector<8x16xf32> to vector<8xf32>
    %17 = vector.shape_cast %16 : vector<8xf32> to vector<8x1xf32>
    %18 = tpu.reciprocal %17 {approx = true} : vector<8x1xf32> -> vector<8x1xf32>
    %19 = vector.broadcast %18 : vector<8x1xf32> to vector<8x16xf32>
    %20 = arith.mulf %15, %19 : vector<8x16xf32>
    %21 = arith.truncf %20 : vector<8x16xf32> to vector<8x16xbf16>
    %cst_7 = arith.constant dense<0.000000e+00> : vector<8x8xf32>
    %22 = tpu.matmul %21, %10, %cst_7 {dimension_numbers = #tpu.dot_dimension_numbers<[1], [0], [0], [1], [0, 0, 1, 1], [], []>} : vector<8x16xbf16>, vector<16x8xbf16>, vector<8x8xf32> -> vector<8x8xf32>
    %23 = arith.truncf %22 : vector<8x8xf32> to vector<8x8xbf16>
    %c0_8 = arith.constant 0 : index
    %c0_9 = arith.constant 0 : index
    %c0_10 = arith.constant 0 : index
    %24 = vector.load %arg3[%c0_8, %c0_9, %c0_10] : memref<1x8x32xbf16, #tpu.memory_space<vmem>>, vector<1x8x8xbf16>
    %25 = vector.shape_cast %24 : vector<1x8x8xbf16> to vector<8x8xbf16>
    %26 = vector.shape_cast %23 : vector<8x8xbf16> to vector<1x8x8xbf16>
    tpu.vector_store %arg3[%c0_8, %c0_9, %c0_10], %26 {strides = array<i32>} : memref<1x8x32xbf16, #tpu.memory_space<vmem>>, vector<1x8x8xbf16>,
    %27 = vector.extract_strided_slice %3 {offsets = [0, 8], sizes = [8, 8], strides = [1, 1]} : vector<8x32xbf16> to vector<8x8xbf16>
    %28 = vector.extract_strided_slice %4 {offsets = [0, 8], sizes = [16, 8], strides = [1, 1]} : vector<16x32xbf16> to vector<16x8xbf16>
    %29 = tpu.transpose %28, [1, 0] : vector<16x8xbf16> -> vector<8x16xbf16>
    %cst_11 = arith.constant dense<0.000000e+00> : vector<8x16xf32>
    %30 = tpu.matmul %27, %29, %cst_11 {dimension_numbers = #tpu.dot_dimension_numbers<[1], [0], [0], [1], [0, 0, 1, 1], [], []>} : vector<8x8xbf16>, vector<8x16xbf16>, vector<8x16xf32> -> vector<8x16xf32>
    %31 = vector.extract_strided_slice %5 {offsets = [0, 8], sizes = [16, 8], strides = [1, 1]} : vector<16x32xbf16> to vector<16x8xbf16>
    %cst_12 = arith.constant dense<0xFF800000> : vector<8xf32>
    %32 = vector.multi_reduction <maximumf>, %30, %cst_12 [1] : vector<8x16xf32> to vector<8xf32>
    %33 = vector.shape_cast %32 : vector<8xf32> to vector<8x1xf32>
    %34 = vector.broadcast %33 : vector<8x1xf32> to vector<8x16xf32>
    %35 = arith.subf %30, %34 : vector<8x16xf32>
    %36 = math.exp %35 : vector<8x16xf32>
    %cst_13 = arith.constant dense<0.000000e+00> : vector<8xf32>
    %37 = vector.multi_reduction <add>, %36, %cst_13 [1] : vector<8x16xf32> to vector<8xf32>
    %38 = vector.shape_cast %37 : vector<8xf32> to vector<8x1xf32>
    %39 = tpu.reciprocal %38 {approx = true} : vector<8x1xf32> -> vector<8x1xf32>
    %40 = vector.broadcast %39 : vector<8x1xf32> to vector<8x16xf32>
    %41 = arith.mulf %36, %40 : vector<8x16xf32>
    %42 = arith.truncf %41 : vector<8x16xf32> to vector<8x16xbf16>
    %cst_14 = arith.constant dense<0.000000e+00> : vector<8x8xf32>
    %43 = tpu.matmul %42, %31, %cst_14 {dimension_numbers = #tpu.dot_dimension_numbers<[1], [0], [0], [1], [0, 0, 1, 1], [], []>} : vector<8x16xbf16>, vector<16x8xbf16>, vector<8x8xf32> -> vector<8x8xf32>
    %44 = arith.truncf %43 : vector<8x8xf32> to vector<8x8xbf16>
    %c0_15 = arith.constant 0 : index
    %c0_16 = arith.constant 0 : index
    %c8 = arith.constant 8 : index
    %45 = vector.load %arg3[%c0_15, %c0_16, %c8] : memref<1x8x32xbf16, #tpu.memory_space<vmem>>, vector<1x8x8xbf16>
    %46 = vector.shape_cast %45 : vector<1x8x8xbf16> to vector<8x8xbf16>
    %47 = vector.shape_cast %44 : vector<8x8xbf16> to vector<1x8x8xbf16>
    tpu.vector_store %arg3[%c0_15, %c0_16, %c8], %47 {strides = array<i32>} : memref<1x8x32xbf16, #tpu.memory_space<vmem>>, vector<1x8x8xbf16>,
    %48 = vector.extract_strided_slice %3 {offsets = [0, 16], sizes = [8, 8], strides = [1, 1]} : vector<8x32xbf16> to vector<8x8xbf16>
    %49 = vector.extract_strided_slice %4 {offsets = [0, 16], sizes = [16, 8], strides = [1, 1]} : vector<16x32xbf16> to vector<16x8xbf16>
    %50 = tpu.transpose %49, [1, 0] : vector<16x8xbf16> -> vector<8x16xbf16>
    %cst_17 = arith.constant dense<0.000000e+00> : vector<8x16xf32>
    %51 = tpu.matmul %48, %50, %cst_17 {dimension_numbers = #tpu.dot_dimension_numbers<[1], [0], [0], [1], [0, 0, 1, 1], [], []>} : vector<8x8xbf16>, vector<8x16xbf16>, vector<8x16xf32> -> vector<8x16xf32>
    %52 = vector.extract_strided_slice %5 {offsets = [0, 16], sizes = [16, 8], strides = [1, 1]} : vector<16x32xbf16> to vector<16x8xbf16>
    %cst_18 = arith.constant dense<0xFF800000> : vector<8xf32>
    %53 = vector.multi_reduction <maximumf>, %51, %cst_18 [1] : vector<8x16xf32> to vector<8xf32>
    %54 = vector.shape_cast %53 : vector<8xf32> to vector<8x1xf32>
    %55 = vector.broadcast %54 : vector<8x1xf32> to vector<8x16xf32>
    %56 = arith.subf %51, %55 : vector<8x16xf32>
    %57 = math.exp %56 : vector<8x16xf32>
    %cst_19 = arith.constant dense<0.000000e+00> : vector<8xf32>
    %58 = vector.multi_reduction <add>, %57, %cst_19 [1] : vector<8x16xf32> to vector<8xf32>
    %59 = vector.shape_cast %58 : vector<8xf32> to vector<8x1xf32>
    %60 = tpu.reciprocal %59 {approx = true} : vector<8x1xf32> -> vector<8x1xf32>
    %61 = vector.broadcast %60 : vector<8x1xf32> to vector<8x16xf32>
    %62 = arith.mulf %57, %61 : vector<8x16xf32>
    %63 = arith.truncf %62 : vector<8x16xf32> to vector<8x16xbf16>
    %cst_20 = arith.constant dense<0.000000e+00> : vector<8x8xf32>
    %64 = tpu.matmul %63, %52, %cst_20 {dimension_numbers = #tpu.dot_dimension_numbers<[1], [0], [0], [1], [0, 0, 1, 1], [], []>} : vector<8x16xbf16>, vector<16x8xbf16>, vector<8x8xf32> -> vector<8x8xf32>
    %65 = arith.truncf %64 : vector<8x8xf32> to vector<8x8xbf16>
    %c0_21 = arith.constant 0 : index
    %c0_22 = arith.constant 0 : index
    %c16 = arith.constant 16 : index
    %66 = vector.load %arg3[%c0_21, %c0_22, %c16] : memref<1x8x32xbf16, #tpu.memory_space<vmem>>, vector<1x8x8xbf16>
    %67 = vector.shape_cast %66 : vector<1x8x8xbf16> to vector<8x8xbf16>
    %68 = vector.shape_cast %65 : vector<8x8xbf16> to vector<1x8x8xbf16>
    tpu.vector_store %arg3[%c0_21, %c0_22, %c16], %68 {strides = array<i32>} : memref<1x8x32xbf16, #tpu.memory_space<vmem>>, vector<1x8x8xbf16>,
    %69 = vector.extract_strided_slice %3 {offsets = [0, 24], sizes = [8, 8], strides = [1, 1]} : vector<8x32xbf16> to vector<8x8xbf16>
    %70 = vector.extract_strided_slice %4 {offsets = [0, 24], sizes = [16, 8], strides = [1, 1]} : vector<16x32xbf16> to vector<16x8xbf16>
    %71 = tpu.transpose %70, [1, 0] : vector<16x8xbf16> -> vector<8x16xbf16>
    %cst_23 = arith.constant dense<0.000000e+00> : vector<8x16xf32>
    %72 = tpu.matmul %69, %71, %cst_23 {dimension_numbers = #tpu.dot_dimension_numbers<[1], [0], [0], [1], [0, 0, 1, 1], [], []>} : vector<8x8xbf16>, vector<8x16xbf16>, vector<8x16xf32> -> vector<8x16xf32>
    %73 = vector.extract_strided_slice %5 {offsets = [0, 24], sizes = [16, 8], strides = [1, 1]} : vector<16x32xbf16> to vector<16x8xbf16>
    %cst_24 = arith.constant dense<0xFF800000> : vector<8xf32>
    %74 = vector.multi_reduction <maximumf>, %72, %cst_24 [1] : vector<8x16xf32> to vector<8xf32>
    %75 = vector.shape_cast %74 : vector<8xf32> to vector<8x1xf32>
    %76 = vector.broadcast %75 : vector<8x1xf32> to vector<8x16xf32>
    %77 = arith.subf %72, %76 : vector<8x16xf32>
    %78 = math.exp %77 : vector<8x16xf32>
    %cst_25 = arith.constant dense<0.000000e+00> : vector<8xf32>
    %79 = vector.multi_reduction <add>, %78, %cst_25 [1] : vector<8x16xf32> to vector<8xf32>
    %80 = vector.shape_cast %79 : vector<8xf32> to vector<8x1xf32>
    %81 = tpu.reciprocal %80 {approx = true} : vector<8x1xf32> -> vector<8x1xf32>
    %82 = vector.broadcast %81 : vector<8x1xf32> to vector<8x16xf32>
    %83 = arith.mulf %78, %82 : vector<8x16xf32>
    %84 = arith.truncf %83 : vector<8x16xf32> to vector<8x16xbf16>
    %cst_26 = arith.constant dense<0.000000e+00> : vector<8x8xf32>
    %85 = tpu.matmul %84, %73, %cst_26 {dimension_numbers = #tpu.dot_dimension_numbers<[1], [0], [0], [1], [0, 0, 1, 1], [], []>} : vector<8x16xbf16>, vector<16x8xbf16>, vector<8x8xf32> -> vector<8x8xf32>
    %86 = arith.truncf %85 : vector<8x8xf32> to vector<8x8xbf16>
    %c0_27 = arith.constant 0 : index
    %c0_28 = arith.constant 0 : index
    %c24 = arith.constant 24 : index
    %87 = vector.load %arg3[%c0_27, %c0_28, %c24] : memref<1x8x32xbf16, #tpu.memory_space<vmem>>, vector<1x8x8xbf16>
    %88 = vector.shape_cast %87 : vector<1x8x8xbf16> to vector<8x8xbf16>
    %89 = vector.shape_cast %86 : vector<8x8xbf16> to vector<1x8x8xbf16>
    tpu.vector_store %arg3[%c0_27, %c0_28, %c24], %89 {strides = array<i32>} : memref<1x8x32xbf16, #tpu.memory_space<vmem>>, vector<1x8x8xbf16>,
    return
  }
  func.func @transform_0(%arg0: i32) -> (i32, i32, i32) {
    %c0_i32 = arith.constant 0 : i32
    %c0_i32_0 = arith.constant 0 : i32
    %c0_i32_1 = arith.constant 0 : i32
    return %arg0, %c0_i32, %c0_i32_0 : i32, i32, i32
  }
  func.func @transform_1(%arg0: i32) -> (i32, i32, i32) {
    %c0_i32 = arith.constant 0 : i32
    %c0_i32_0 = arith.constant 0 : i32
    %c0_i32_1 = arith.constant 0 : i32
    return %arg0, %c0_i32, %c0_i32_0 : i32, i32, i32
  }
  func.func @transform_2(%arg0: i32) -> (i32, i32, i32) {
    %c0_i32 = arith.constant 0 : i32
    %c0_i32_0 = arith.constant 0 : i32
    %c0_i32_1 = arith.constant 0 : i32
    return %arg0, %c0_i32, %c0_i32_0 : i32, i32, i32
  }
}

module attributes {stable_mosaic.version = 11 : i64} {
  func.func @_ffn_add_ln_kernel(%arg0: i32, %arg1: memref<16x32xf32, #tpu.memory_space<vmem>>, %arg2: memref<32x64xbf16, #tpu.memory_space<vmem>>, %arg3: memref<1x64xf32, #tpu.memory_space<vmem>>, %arg4: memref<64x32xbf16, #tpu.memory_space<vmem>>, %arg5: memref<1x32xf32, #tpu.memory_space<vmem>>, %arg6: memref<1x32xf32, #tpu.memory_space<vmem>>, %arg7: memref<1x32xf32, #tpu.memory_space<vmem>>, %arg8: memref<16x32xf32, #tpu.memory_space<vmem>>) attributes {dimension_semantics = [#tpu.dimension_semantics<parallel>], iteration_bounds = array<i64: 1>, scalar_prefetch = 0 : i64, scratch_operands = 0 : i64, tpu.core_type = #tpu.core_type<tc>, window_params = [{transform_indices = @transform_0, window_bounds = array<i64: 16, 32>}, {pipeline_mode = #tpu.pipeline_mode<synchronous>, transform_indices = @transform_1, window_bounds = array<i64: 32, 64>}, {pipeline_mode = #tpu.pipeline_mode<synchronous>, transform_indices = @transform_2, window_bounds = array<i64: 1, 64>}, {pipeline_mode = #tpu.pipeline_mode<synchronous>, transform_indices = @transform_3, window_bounds = array<i64: 64, 32>}, {pipeline_mode = #tpu.pipeline_mode<synchronous>, transform_indices = @transform_4, window_bounds = array<i64: 1, 32>}, {pipeline_mode = #tpu.pipeline_mode<synchronous>, transform_indices = @transform_5, window_bounds = array<i64: 1, 32>}, {pipeline_mode = #tpu.pipeline_mode<synchronous>, transform_indices = @transform_6, window_bounds = array<i64: 1, 32>}, {transform_indices = @transform_7, window_bounds = array<i64: 16, 32>}]} {
    %c0 = arith.constant 0 : index
    %c0_0 = arith.constant 0 : index
    %0 = vector.load %arg1[%c0, %c0_0] : memref<16x32xf32, #tpu.memory_space<vmem>>, vector<16x32xf32>
    %1 = arith.truncf %0 : vector<16x32xf32> to vector<16x32xbf16>
    %c0_1 = arith.constant 0 : index
    %c0_2 = arith.constant 0 : index
    %2 = vector.load %arg2[%c0_1, %c0_2] : memref<32x64xbf16, #tpu.memory_space<vmem>>, vector<32x64xbf16>
    %cst = arith.constant dense<0.000000e+00> : vector<16x64xf32>
    %3 = tpu.matmul %1, %2, %cst {dimension_numbers = #tpu.dot_dimension_numbers<[1], [0], [0], [1], [0, 0, 1, 1], [], []>} : vector<16x32xbf16>, vector<32x64xbf16>, vector<16x64xf32> -> vector<16x64xf32>
    %c0_3 = arith.constant 0 : index
    %c0_4 = arith.constant 0 : index
    %4 = vector.load %arg3[%c0_3, %c0_4] : memref<1x64xf32, #tpu.memory_space<vmem>>, vector<1x64xf32>
    %5 = vector.broadcast %4 : vector<1x64xf32> to vector<16x64xf32>
    %6 = arith.addf %3, %5 : vector<16x64xf32>
    %cst_5 = arith.constant 0.000000e+00 : f32
    %7 = vector.broadcast %cst_5 : f32 to vector<16x64xf32>
    %8 = arith.maximumf %6, %7 : vector<16x64xf32>
    %9 = arith.truncf %8 : vector<16x64xf32> to vector<16x64xbf16>
    %c0_6 = arith.constant 0 : index
    %c0_7 = arith.constant 0 : index
    %10 = vector.load %arg4[%c0_6, %c0_7] : memref<64x32xbf16, #tpu.memory_space<vmem>>, vector<64x32xbf16>
    %cst_8 = arith.constant dense<0.000000e+00> : vector<16x32xf32>
    %11 = tpu.matmul %9, %10, %cst_8 {dimension_numbers = #tpu.dot_dimension_numbers<[1], [0], [0], [1], [0, 0, 1, 1], [], []>} : vector<16x64xbf16>, vector<64x32xbf16>, vector<16x32xf32> -> vector<16x32xf32>
    %c0_9 = arith.constant 0 : index
    %c0_10 = arith.constant 0 : index
    %12 = vector.load %arg5[%c0_9, %c0_10] : memref<1x32xf32, #tpu.memory_space<vmem>>, vector<1x32xf32>
    %13 = vector.broadcast %12 : vector<1x32xf32> to vector<16x32xf32>
    %14 = arith.addf %11, %13 : vector<16x32xf32>
    %15 = arith.addf %0, %14 : vector<16x32xf32>
    %c0_11 = arith.constant 0 : index
    %c0_12 = arith.constant 0 : index
    %16 = vector.load %arg6[%c0_11, %c0_12] : memref<1x32xf32, #tpu.memory_space<vmem>>, vector<1x32xf32>
    %c0_13 = arith.constant 0 : index
    %c0_14 = arith.constant 0 : index
    %17 = vector.load %arg7[%c0_13, %c0_14] : memref<1x32xf32, #tpu.memory_space<vmem>>, vector<1x32xf32>
    %cst_15 = arith.constant dense<0.000000e+00> : vector<16xf32>
    %18 = vector.multi_reduction <add>, %15, %cst_15 [1] : vector<16x32xf32> to vector<16xf32>
    %19 = vector.shape_cast %18 : vector<16xf32> to vector<16x1xf32>
    %cst_16 = arith.constant 3.200000e+01 : f32
    %20 = vector.broadcast %cst_16 : f32 to vector<16x1xf32>
    %21 = arith.divf %19, %20 : vector<16x1xf32>
    %22 = vector.broadcast %21 : vector<16x1xf32> to vector<16x32xf32>
    %23 = arith.subf %15, %22 : vector<16x32xf32>
    %24 = arith.mulf %23, %23 : vector<16x32xf32>
    %cst_17 = arith.constant dense<0.000000e+00> : vector<16xf32>
    %25 = vector.multi_reduction <add>, %24, %cst_17 [1] : vector<16x32xf32> to vector<16xf32>
    %26 = vector.shape_cast %25 : vector<16xf32> to vector<16x1xf32>
    %cst_18 = arith.constant 3.200000e+01 : f32
    %27 = vector.broadcast %cst_18 : f32 to vector<16x1xf32>
    %28 = arith.divf %26, %27 : vector<16x1xf32>
    %29 = vector.broadcast %21 : vector<16x1xf32> to vector<16x32xf32>
    %30 = arith.subf %15, %29 : vector<16x32xf32>
    %cst_19 = arith.constant 9.99999974E-6 : f32
    %31 = vector.broadcast %cst_19 : f32 to vector<16x1xf32>
    %32 = arith.addf %28, %31 : vector<16x1xf32>
    %33 = math.rsqrt %32 : vector<16x1xf32>
    %34 = vector.broadcast %33 : vector<16x1xf32> to vector<16x32xf32>
    %35 = arith.mulf %30, %34 : vector<16x32xf32>
    %36 = vector.broadcast %16 : vector<1x32xf32> to vector<16x32xf32>
    %37 = arith.mulf %35, %36 : vector<16x32xf32>
    %38 = vector.broadcast %17 : vector<1x32xf32> to vector<16x32xf32>
    %39 = arith.addf %37, %38 : vector<16x32xf32>
    %c0_20 = arith.constant 0 : index
    %c0_21 = arith.constant 0 : index
    %40 = vector.load %arg8[%c0_20, %c0_21] : memref<16x32xf32, #tpu.memory_space<vmem>>, vector<16x32xf32>
    tpu.vector_store %arg8[%c0_20, %c0_21], %39 {strides = array<i32>} : memref<16x32xf32, #tpu.memory_space<vmem>>, vector<16x32xf32>,
    return
  }
  func.func @transform_0(%arg0: i32) -> (i32, i32) {
    %c0_i32 = arith.constant 0 : i32
    %c0_i32_0 = arith.constant 0 : i32
    return %arg0, %c0_i32 : i32, i32
  }
  func.func @transform_1(%arg0: i32) -> (i32, i32) {
    %c0_i32 = arith.constant 0 : i32
    %c0_i32_0 = arith.constant 0 : i32
    %c0_i32_1 = arith.constant 0 : i32
    return %c0_i32, %c0_i32_0 : i32, i32
  }
  func.func @transform_2(%arg0: i32) -> (i32, i32) {
    %c0_i32 = arith.constant 0 : i32
    %c0_i32_0 = arith.constant 0 : i32
    %c0_i32_1 = arith.constant 0 : i32
    return %c0_i32, %c0_i32_0 : i32, i32
  }
  func.func @transform_3(%arg0: i32) -> (i32, i32) {
    %c0_i32 = arith.constant 0 : i32
    %c0_i32_0 = arith.constant 0 : i32
    %c0_i32_1 = arith.constant 0 : i32
    return %c0_i32, %c0_i32_0 : i32, i32
  }
  func.func @transform_4(%arg0: i32) -> (i32, i32) {
    %c0_i32 = arith.constant 0 : i32
    %c0_i32_0 = arith.constant 0 : i32
    %c0_i32_1 = arith.constant 0 : i32
    return %c0_i32, %c0_i32_0 : i32, i32
  }
  func.func @transform_5(%arg0: i32) -> (i32, i32) {
    %c0_i32 = arith.constant 0 : i32
    %c0_i32_0 = arith.constant 0 : i32
    %c0_i32_1 = arith.constant 0 : i32
    return %c0_i32, %c0_i32_0 : i32, i32
  }
  func.func @transform_6(%arg0: i32) -> (i32, i32) {
    %c0_i32 = arith.constant 0 : i32
    %c0_i32_0 = arith.constant 0 : i32
    %c0_i32_1 = arith.constant 0 : i32
    return %c0_i32, %c0_i32_0 : i32, i32
  }
  func.func @transform_7(%arg0: i32) -> (i32, i32) {
    %c0_i32 = arith.constant 0 : i32
    %c0_i32_0 = arith.constant 0 : i32
    return %arg0, %c0_i32 : i32, i32
  }
}

module attributes {stable_mosaic.version = 11 : i64} {
  func.func @_linear_kernel(%arg0: i32, %arg1: memref<16x32xf32, #tpu.memory_space<vmem>>, %arg2: memref<32x128xbf16, #tpu.memory_space<vmem>>, %arg3: memref<1x128xf32, #tpu.memory_space<vmem>>, %arg4: memref<16x128xf32, #tpu.memory_space<vmem>>) attributes {dimension_semantics = [#tpu.dimension_semantics<parallel>], iteration_bounds = array<i64: 1>, scalar_prefetch = 0 : i64, scratch_operands = 0 : i64, tpu.core_type = #tpu.core_type<tc>, window_params = [{transform_indices = @transform_0, window_bounds = array<i64: 16, 32>}, {pipeline_mode = #tpu.pipeline_mode<synchronous>, transform_indices = @transform_1, window_bounds = array<i64: 32, 128>}, {pipeline_mode = #tpu.pipeline_mode<synchronous>, transform_indices = @transform_2, window_bounds = array<i64: 1, 128>}, {transform_indices = @transform_3, window_bounds = array<i64: 16, 128>}]} {
    %c0 = arith.constant 0 : index
    %c0_0 = arith.constant 0 : index
    %0 = vector.load %arg1[%c0, %c0_0] : memref<16x32xf32, #tpu.memory_space<vmem>>, vector<16x32xf32>
    %1 = arith.truncf %0 : vector<16x32xf32> to vector<16x32xbf16>
    %c0_1 = arith.constant 0 : index
    %c0_2 = arith.constant 0 : index
    %2 = vector.load %arg2[%c0_1, %c0_2] : memref<32x128xbf16, #tpu.memory_space<vmem>>, vector<32x128xbf16>
    %cst = arith.constant dense<0.000000e+00> : vector<16x128xf32>
    %3 = tpu.matmul %1, %2, %cst {dimension_numbers = #tpu.dot_dimension_numbers<[1], [0], [0], [1], [0, 0, 1, 1], [], []>} : vector<16x32xbf16>, vector<32x128xbf16>, vector<16x128xf32> -> vector<16x128xf32>
    %c0_3 = arith.constant 0 : index
    %c0_4 = arith.constant 0 : index
    %4 = vector.load %arg3[%c0_3, %c0_4] : memref<1x128xf32, #tpu.memory_space<vmem>>, vector<1x128xf32>
    %5 = vector.broadcast %4 : vector<1x128xf32> to vector<16x128xf32>
    %6 = arith.addf %3, %5 : vector<16x128xf32>
    %c0_5 = arith.constant 0 : index
    %c0_6 = arith.constant 0 : index
    %7 = vector.load %arg4[%c0_5, %c0_6] : memref<16x128xf32, #tpu.memory_space<vmem>>, vector<16x128xf32>
    tpu.vector_store %arg4[%c0_5, %c0_6], %6 {strides = array<i32>} : memref<16x128xf32, #tpu.memory_space<vmem>>, vector<16x128xf32>,
    return
  }
  func.func @transform_0(%arg0: i32) -> (i32, i32) {
    %c0_i32 = arith.constant 0 : i32
    %c0_i32_0 = arith.constant 0 : i32
    return %arg0, %c0_i32 : i32, i32
  }
  func.func @transform_1(%arg0: i32) -> (i32, i32) {
    %c0_i32 = arith.constant 0 : i32
    %c0_i32_0 = arith.constant 0 : i32
    %c0_i32_1 = arith.constant 0 : i32
    return %c0_i32, %c0_i32_0 : i32, i32
  }
  func.func @transform_2(%arg0: i32) -> (i32, i32) {
    %c0_i32 = arith.constant 0 : i32
    %c0_i32_0 = arith.constant 0 : i32
    %c0_i32_1 = arith.constant 0 : i32
    return %c0_i32, %c0_i32_0 : i32, i32
  }
  func.func @transform_3(%arg0: i32) -> (i32, i32) {
    %c0_i32 = arith.constant 0 : i32
    %c0_i32_0 = arith.constant 0 : i32
    return %arg0, %c0_i32 : i32, i32
  }
}

</mosaic_0001>

<bundles_post_ra>
// kernel: ocr_forward.21
= control target key start
LH: loop header
LB: loop body
LE: loop exit
PB: predicated region body
PF: predicated region fallthrough
CT: control target
= control target key end

     0   :  { %v181_v0 = vmov 0.0   ;;  %vm182_vm0 = vmmov 0   ;;  %vm54_vm1 = vcmask 261120   ;;  %s255_s1 = inlined_call_operand.vmem [shape: bf16[32,32], index: 1, kind: input, shape index: {}]   ;;  %s256_s0 = inlined_call_operand.vmem [shape: bf16[16,32], index: 0, kind: input, shape index: {}]   ;;  %s257_s2 = inlined_call_operand.vmem [shape: f32[1,32], index: 2, kind: input, shape index: {}]   ;;  %s258_s3 = inlined_call_operand.vmem [shape: f32[16,32], index: 3, kind: input, shape index: {}]   ;;  %s259_s4 = inlined_call_operand.vmem [shape: f32[1,32], index: 4, kind: input, shape index: {}]   ;;  %s260_s5 = inlined_call_operand.vmem [shape: f32[1,32], index: 5, kind: input, shape index: {}]   ;;  %s261_s6 = inlined_call_operand.vmem [shape: f32[16,32], index: 6, kind: output, shape index: {}]  }
   0x1   :  { %164 = vmatprep.subr.bf16.mxu0 %v181_v0  ;;  %v174_v1 = vld [vmem:[%s255_s1] sm:$0xff]   ;;  %168 = vmatprep.mubr.msk.bf16.mxu0 %vm182_vm0, %v181_v0  ;;  %v175_v2 = vld [vmem:[%s255_s1 + $0x8] sm:$0xff]  }
   0x2   :  { %165 = vmatpush3.bf16.msra.mxu0 %v174_v1  ;;  %v176_v3 = vld [vmem:[%s256_s0] sm:$0xff]   ;;  %v100_v10 = vld [vmem:[%s258_s3 + $0x8] sm:$0xff] }
   0x3   :  { %166 = vmatprep.subr.bf16.mxu0 %v181_v0  ;;  %v154_v4 = vld [vmem:[%s257_s2] ss:$0 sm:$0xff] }
   0x4   :  { %v99_v6 = vld [vmem:[%s258_s3] sm:$0xff] }
   0x5   :  { %v159_v34 = vld [vmem:[%s259_s4] ss:$0 sm:$0xff] }
   0x6   :  { %167 = vmatpush3.bf16.msra.mxu0 %v175_v2  ;;  %v160_v36 = vld [vmem:[%s260_s5] ss:$0 sm:$0xff] }
   0x9   :  { %169 = vmatmul.mubr.msk.bf16.vlgmr.msra.gmra.mrb[0].mxu0 %vm54_vm1, %v176_v3 }
  0xdc   :  { %v92_v5 = vpop.f32.mrb[0].mxu0 }
  0xdd   :  { %v93_v7 = vadd.f32 %v154_v4, %v92_v5  ;;  %v170_v8 = vpop.f32.mrb[1].mxu0 }
  0xde   :  { %v95_v9 = vpop.f32.mrb[2].mxu0 }
  0xdf   :  { %v96_v11 = vadd.f32 %v154_v4, %v95_v9  ;;  %v171_v12 = vpop.f32.mrb[3].mxu0  ;;  %v101_v13 = vadd.f32 %v99_v6, %v93_v7 }
  0xe1   :  { %v105_v14 = vsel %vm54_vm1, %v101_v13, 0.0  ;;  %v102_v15 = vadd.f32 %v100_v10, %v96_v11 }
  0xe2   :  { %106 = vadd.xlane.f32.xlu0 %v105_v14 }
  0xe3   :  { %v108_v16 = vsel %vm54_vm1, %v102_v15, 0.0 }
  0xe6   :  { %109 = vadd.xlane.f32.xlu0 %v108_v16 }
 0x16f   :  { %v107_v17 = vpop.xlane.xlu0 %106 }
 0x170   :  { %v112_v18 = vmul.f32 0.03125, %v107_v17 }
 0x172   :  { %v114_v19 = vsub.f32 %v101_v13, %v112_v18 }
 0x173   :  { %v110_v20 = vpop.xlane.xlu0 %109 }
 0x174   :  { %v113_v21 = vmul.f32 0.03125, %v110_v20  ;;  %v116_v22 = vmul.f32 %v114_v19, %v114_v19 }
 0x176   :  { %v115_v23 = vsub.f32 %v102_v15, %v113_v21  ;;  %v118_v24 = vsel %vm54_vm1, %v116_v22, 0.0 }
 0x177   :  { %119 = vadd.xlane.f32.xlu1 %v118_v24 }
 0x178   :  { %v117_v25 = vmul.f32 %v115_v23, %v115_v23 }
 0x17a   :  { %v121_v26 = vsel %vm54_vm1, %v117_v25, 0.0 }
 0x17b   :  { %122 = vadd.xlane.f32.xlu1 %v121_v26 }
 0x204   :  { %v120_v27 = vpop.xlane.xlu1 %119 }
 0x205   :  { %v124_v28 = vmul.f32 0.03125, %v120_v27 }
 0x207   :  { %v126_v29 = vadd.f32 1e-05, %v124_v28 }
 0x208   :  { %v123_v30 = vpop.xlane.xlu1 %122 }
 0x209   :  { %177 = vrsqrt.f32 %v126_v29  ;;  %v125_v31 = vmul.f32 0.03125, %v123_v30 }
 0x20b   :  { %v127_v32 = vadd.f32 1e-05, %v125_v31 }
 0x20d   :  { %179 = vrsqrt.f32 %v127_v32 }
 0x213   :  { %v178_v33 = vpop.eup %177 }
 0x214   :  { %v130_v35 = vmul.f32 %v178_v33, %v114_v19 }
 0x216   :  { %v138_v37 = vmul.f32 %v159_v34, %v130_v35 }
 0x217   :  { %v180_v38 = vpop.eup %179 }
 0x218   :  { %v146_v39 = vadd.f32 %v160_v36, %v138_v37  ;;  %v131_v40 = vmul.f32 %v180_v38, %v115_v23 }
 0x21a   :  { %148 = vst.msk [vmem:[%s261_s6] sm:$0xff] %vm54_vm1, %v146_v39  ;;  %v139_v41 = vmul.f32 %v159_v34, %v131_v40 }
 0x21c   :  { %v147_v42 = vadd.f32 %v160_v36, %v139_v41 }
 0x21e   :  { %149 = vst.msk [vmem:[%s261_s6 + $0x8] sm:$0xff] %vm54_vm1, %v147_v42 }

// kernel: ocr_forward.19
= control target key start
LH: loop header
LB: loop body
LE: loop exit
PB: predicated region body
PF: predicated region fallthrough
CT: control target
= control target key end

     0   :  { %v124_v0 = vmov 0.0   ;;  %vm125_vm0 = vmmov 0   ;;  %vm41_vm1 = vcmask 261120   ;;  %vm94_vm2 = vcmask 781312   ;;  %s167_s1 = inlined_call_operand.vmem [shape: bf16[32,96], index: 1, kind: input, shape index: {}]   ;;  %s168_s0 = inlined_call_operand.vmem [shape: f32[16,32], index: 0, kind: input, shape index: {}]   ;;  %s169_s2 = inlined_call_operand.vmem [shape: f32[1,96], index: 2, kind: input, shape index: {}]   ;;  %s170_s3 = inlined_call_operand.vmem [shape: bf16[16,96], index: 3, kind: output, shape index: {}]  }
   0x1   :  { %112 = vmatprep.subr.bf16.mxu0 %v124_v0  ;;  %v122_v1 = vld [vmem:[%s167_s1] sm:$0xff]   ;;  %116 = vmatprep.mubr.msk.bf16.mxu0 %vm125_vm0, %v124_v0  ;;  %v123_v2 = vld [vmem:[%s167_s1 + $0x8] sm:$0xff]  }
   0x2   :  { %113 = vmatpush3.bf16.msra.mxu0 %v122_v1  ;;  %v15_v3 = vld [vmem:[%s168_s0] sm:$0xff]  ;;  %v16_v4 = vld [vmem:[%s168_s0 + $0x8] sm:$0xff] }
   0x3   :  { %114 = vmatprep.subr.bf16.mxu0 %v124_v0  ;;  %v17_v5 = vpack.c.bf16 %v16_v4, %v15_v3  ;;  %v101_v6 = vld [vmem:[%s169_s2] ss:$0 sm:$0xff] }
   0x6   :  { %115 = vmatpush3.bf16.msra.mxu0 %v123_v2 }
   0x9   :  { %117 = vmatmul.mubr.msk.bf16.vlgmr.msra.gmra.mrb[0].mxu0 %vm41_vm1, %v17_v5 }
  0xdc   :  { %v79_v7 = vpop.f32.mrb[0].mxu0 }
  0xdd   :  { %v80_v8 = vadd.f32 %v101_v6, %v79_v7  ;;  %v118_v9 = vpop.f32.mrb[1].mxu0 }
  0xde   :  { %v82_v10 = vpop.f32.mrb[2].mxu0 }
  0xdf   :  { %v107_v11 = vpack.c.bf16 %v80_v8, %v80_v8  ;;  %v83_v12 = vadd.f32 %v101_v6, %v82_v10  ;;  %v119_v13 = vpop.f32.mrb[3].mxu0 }
  0xe1   :  { %95 = vst.msk [vmem:[%s170_s3] sm:$0xf] %vm94_vm2, %v107_v11  ;;  %v108_v14 = vpack.c.bf16 %v83_v12, %v83_v12 }
  0xe3   :  { %96 = vst.msk [vmem:[%s170_s3 + $0x4] sm:$0xf] %vm94_vm2, %v108_v14 }

// kernel: ocr_forward.22
= control target key start
LH: loop header
LB: loop body
LE: loop exit
PB: predicated region body
PF: predicated region fallthrough
CT: control target
= control target key end

     0   :  { %v124_v0 = vmov 0.0   ;;  %vm125_vm0 = vmmov 0   ;;  %vm41_vm1 = vcmask 261120   ;;  %vm94_vm2 = vcmask 257024   ;;  %s167_s1 = inlined_call_operand.vmem [shape: bf16[32,32], index: 1, kind: input, shape index: {}]   ;;  %s168_s0 = inlined_call_operand.vmem [shape: f32[16,32], index: 0, kind: input, shape index: {}]   ;;  %s169_s2 = inlined_call_operand.vmem [shape: f32[1,32], index: 2, kind: input, shape index: {}]   ;;  %s170_s3 = inlined_call_operand.vmem [shape: bf16[16,32], index: 3, kind: output, shape index: {}]  }
   0x1   :  { %112 = vmatprep.subr.bf16.mxu0 %v124_v0  ;;  %v122_v1 = vld [vmem:[%s167_s1] sm:$0xff]   ;;  %116 = vmatprep.mubr.msk.bf16.mxu0 %vm125_vm0, %v124_v0  ;;  %v123_v2 = vld [vmem:[%s167_s1 + $0x8] sm:$0xff]  }
   0x2   :  { %113 = vmatpush3.bf16.msra.mxu0 %v122_v1  ;;  %v15_v3 = vld [vmem:[%s168_s0] sm:$0xff]  ;;  %v16_v4 = vld [vmem:[%s168_s0 + $0x8] sm:$0xff] }
   0x3   :  { %114 = vmatprep.subr.bf16.mxu0 %v124_v0  ;;  %v17_v5 = vpack.c.bf16 %v16_v4, %v15_v3  ;;  %v101_v6 = vld [vmem:[%s169_s2] ss:$0 sm:$0xff] }
   0x6   :  { %115 = vmatpush3.bf16.msra.mxu0 %v123_v2 }
   0x9   :  { %117 = vmatmul.mubr.msk.bf16.vlgmr.msra.gmra.mrb[0].mxu0 %vm41_vm1, %v17_v5 }
  0xdc   :  { %v79_v7 = vpop.f32.mrb[0].mxu0 }
  0xdd   :  { %v80_v8 = vadd.f32 %v101_v6, %v79_v7  ;;  %v118_v9 = vpop.f32.mrb[1].mxu0 }
  0xde   :  { %v82_v10 = vpop.f32.mrb[2].mxu0 }
  0xdf   :  { %v107_v11 = vpack.c.bf16 %v80_v8, %v80_v8  ;;  %v83_v12 = vadd.f32 %v101_v6, %v82_v10  ;;  %v119_v13 = vpop.f32.mrb[3].mxu0 }
  0xe1   :  { %95 = vst.msk [vmem:[%s170_s3] sm:$0xf] %vm94_vm2, %v107_v11  ;;  %v108_v14 = vpack.c.bf16 %v83_v12, %v83_v12 }
  0xe3   :  { %96 = vst.msk [vmem:[%s170_s3 + $0x4] sm:$0xf] %vm94_vm2, %v108_v14 }

// kernel: ocr_forward.20
= control target key start
LH: loop header
LB: loop body
LE: loop exit
PB: predicated region body
PF: predicated region fallthrough
CT: control target
= control target key end

     0   :  { %s873_s9 = smov 0   ;;  %s975_s0 = inlined_call_operand.vmem [shape: bf16[2,8,96], index: 0, kind: input, shape index: {}]   ;;  %s976_s1 = inlined_call_operand.vmem [shape: f32[2,1,8], index: 1, kind: input, shape index: {}]   ;;  %s977_s2 = inlined_call_operand.vmem [shape: bf16[2,8,32], index: 2, kind: output, shape index: {}]  }
   0x1 LB: > { %s704_s10 = sadd.s32 4294967295, %s840_s9   ;;  %p708_p0 = scmp.ge.s32.totalorder %s840_s9, 1  ;;  %s840_s9 = sphi %s873_s9, %s12_s9  }
   0x2   : > { %p119_p1 = scmp.lt.s32.totalorder %s840_s9, 3 }
   0x4   : > { %p120_p2 = pnand %p708_p0, %p119_p1 }
   0x5   : > { %p142_p3 = scmp.lt.s32.totalorder (!%p120_p2), %s704_s10, 1  ;;  %v842_v0 = vmov (!%p120_p2), 0.0   ;;  %vm843_vm0 = vmmov (!%p120_p2), 0   ;;  %s844_s15 = smov (!%p120_p2), 96   ;;  %vm174_vm1 = vcmask (!%p120_p2), 64512   ;;  %v155_v5 = vlaneseq (!%p120_p2) }
   0x6   : > { %123 = sbr.rel (%p120_p2) target bundleno = 1601 (0x641), region = 28  ;;  %745 = vmatprep.subr.bf16.mxu0 (!%p120_p2), %v842_v0  ;;  %747 = vmatprep.mubr.msk.bf16.mxu0 (!%p120_p2), %vm843_vm0, %v842_v0  ;;  %s845_s16 = smov (!%p120_p2), 64   ;;  %vm238_vm3 = vcmask (!%p120_p2), 1043456   ;;  %vm283_vm4 = vcmask (!%p120_p2), 60416   ;;  %vm402_vm5 = vcmask (!%p120_p2), 126016   ;;  %vm521_vm6 = vcmask (!%p120_p2), 191616  }
   0x7   : > { %751 = vmatprep.subr.bf16.mxu1 (!%p120_p2), %v842_v0  ;;  %753 = vmatprep.mubr.msk.bf16.mxu1 (!%p120_p2), %vm843_vm0, %v842_v0  ;;  %s846_s17 = smov (!%p120_p2), 88   ;;  %v156_v6 = vshrl.u32 (!%p120_p2), %v155_v5, 7  ;;  %v158_v7 = vand.u32 (!%p120_p2), 127, %v155_v5  ;;  %s847_s21 = smov (!%p120_p2), 72   ;;  %vm640_vm7 = vcmask (!%p120_p2), 257216  }
   0x8   : > { %s848_s22 = smov (!%p120_p2), 120   ;;  %s849_s23 = smov (!%p120_p2), 80  }
   0x9   : > { %vm159_vm2 = vcmp.gt.s32.totalorder (!%p120_p2), %v158_v7, %v156_v6  ;;  %s850_s24 = smov (!%p120_p2), 112   ;;  %s851_s25 = smov (!%p120_p2), 104  }
   0xa   : > { %v160_v8 = vsel (!%p120_p2), %vm159_vm2, -1e+30, %v842_v0  ;;  %s852_s29 = smov (!%p120_p2), 56   ;;  %s853_s30 = smov (!%p120_p2), 48  }
   0xb   : > { %s854_s3 = smov (!%p120_p2), 40   ;;  %s855_s4 = smov (!%p120_p2), 8  }
   0xc   : > { %s856_s5 = smov (!%p120_p2), 16   ;;  %s857_s6 = smov (!%p120_p2), 24  }
   0xd   : > { %s979_s10 = smov (!%p142_p3, %s704_s10), 1 }
   0xe   : > { %s709_s11 = sshll.u32 %s979_s10, 2  ;;  %s148_s20 = scalar_lea.vmem %s976_s1, %s979_s10 }
   0xf   : > { %s145_s14 = scalar_lea.vmem %s975_s0, %s709_s11  ;;  %v711_v9 = vld [vmem:[%s148_s20] ss:$0 sm:$0xff]  ;;  %s942_s28 = scalar_lea.vmem %s977_s2, %s709_s11 }
  0x10   : > { %v154_v1 = vld [vmem:[%s145_s14] sm:$0xf]  ;;  %v910_v10 = vadd.f32 %v711_v9, %v160_v8 }
  0x11   : > { %v895_v2 = vcombine.low %v154_v1, %v154_v1 }
  0x13   : > { %172 = vrot.lane.b32.xlu0 %v895_v2, %s844_s15  ;;  %233 = vrot.lane.b32.xlu1 %v895_v2, %s845_s16 }
  0x17   : > { %287 = vrot.lane.b32.xlu1 %v895_v2, %s846_s17 }
  0x85   : > { %v173_v3 = vpop.permute.xlu0 %172  ;;  %v234_v17 = vpop.permute.xlu1 %233 }
  0x86   : > { %v179_v4 = vsel %vm174_vm1, %v173_v3, 0  ;;  %v240_v18 = vsel %vm238_vm3, %v234_v17, 0 }
  0x87   : > { %746 = vmatpush3.bf16.xpose.msra.mxu0 %v179_v4  ;;  %752 = vmatpush3.bf16.msra.mxu1 %v240_v18 }
  0x88   : > { %763 = vmatprep.subr.bf16.mxu0 %v842_v0  ;;  %757 = vmatprep.subr.bf16.mxu1 %v842_v0 }
  0x89   : > { %v288_v24 = vpop.permute.xlu1 %287 }
  0x8a   : > { %v293_v30 = vsel %vm174_vm1, %v288_v24, 0 }
  0x8e   : > { %748 = vmatmul.mubr.msk.bf16.vlgmr.msra.gmra.mrb[0].mxu0 %vm174_vm1, %v154_v1 }
  0x8f   : > { %765 = vmatprep.mubr.msk.bf16.mxu0 %vm843_vm0, %v842_v0 }
 0x161   : > { %v215_v11 = vpop.f32.mrb[0].mxu0 }
 0x162   : > { %v216_v12 = vadd.f32 %v215_v11, %v910_v10  ;;  %v749_v13 = vpop.f32.mrb[1].mxu0 }
 0x163   : > { %v218_v14 = vpop.f32.mrb[2].mxu0 }
 0x164   : > { %v750_v15 = vpop.f32.mrb[3].mxu0  ;;  %v221_v16 = vsel %vm174_vm1, %v216_v12, -inf }
 0x165   : > { %222 = vmax.xlane.f32.xlu0 %v221_v16 }
 0x17b   : > { %525 = vrot.lane.b32.xlu0 %v895_v2, %s847_s21 }
 0x1f2   : > { %v223_v19 = vpop.xlane.xlu0 %222 }
 0x1f3   : > { %v224_v20 = vsub.f32 %v216_v12, %v223_v19 }
 0x1f5   : > { %v225_v21 = vmul.f32 1.442695, %v224_v20 }
 0x1f6   : > { %v526_v33 = vpop.permute.xlu0 %525 }
 0x1f7   : > { %818 = vpow2.f32 %v225_v21  ;;  %v531_v35 = vsel %vm174_vm1, %v526_v33, 0 }
 0x201   : > { %v819_v22 = vpop.eup %818 }
 0x202   : > { %v227_v23 = vsel %vm174_vm1, %v819_v22, 0.0 }
 0x203   : > { %228 = vadd.xlane.f32.xlu1 %v227_v23 }
 0x214   : > { %285 = vrot.lane.b32.xlu1 %v895_v2, %s848_s22 }
 0x218   : > { %406 = vrot.lane.b32.xlu1 %v895_v2, %s849_s23 }
 0x21c   : > { %404 = vrot.lane.b32.xlu1 %v895_v2, %s850_s24 }
 0x220   : > { %523 = vrot.lane.b32.xlu1 %v895_v2, %s851_s25 }
 0x290   : > { %v229_v25 = vpop.xlane.xlu1 %228 }
 0x291   : > { %820 = vrcp.f32 %v229_v25 }
 0x294   : > { %v286_v28 = vpop.permute.xlu1 %285 }
 0x298   : > { %v407_v31 = vpop.permute.xlu1 %406 }
 0x299   : > { %v412_v32 = vsel %vm174_vm1, %v407_v31, 0 }
 0x29b   : > { %v821_v26 = vpop.eup %820 }
 0x29c   : > { %v231_v27 = vmul.f32 %v821_v26, %v819_v22  ;;  %v405_v34 = vpop.permute.xlu1 %404 }
 0x29e   : > { %v232_v29 = vpack.c.bf16 %v231_v27, %v231_v27 }
 0x2a0   : > { %754 = vmatmul.mubr.msk.bf16.vlgmr.msra.gmra.mrb[0].mxu1 %vm174_vm1, %v232_v29  ;;  %v524_v36 = vpop.permute.xlu1 %523 }
 0x2a1   : > { %758 = vmatpush3.bf16.xpose.msra.mxu1 %v293_v30  ;;  %759 = vmatprep.mubr.msk.bf16.mxu1 %vm843_vm0, %v842_v0 }
 0x2a2   : > { %769 = vmatprep.subr.bf16.mxu1 %v842_v0 }
 0x2a8   : > { %760 = vmatmul.mubr.msk.bf16.vlgmr.msra.gmra.mrb[4].mxu1 %vm174_vm1, %v286_v28 }
 0x2a9   : > { %770 = vmatpush3.bf16.xpose.msra.mxu1 %v412_v32  ;;  %771 = vmatprep.mubr.msk.bf16.mxu1 %vm843_vm0, %v842_v0 }
 0x2aa   : > { %781 = vmatprep.subr.bf16.mxu1 %v842_v0 }
 0x2b0   : > { %772 = vmatmul.mubr.msk.bf16.vlgmr.msra.gmra.mrb[8].mxu1 %vm174_vm1, %v405_v34 }
 0x2b1   : > { %782 = vmatpush3.bf16.xpose.msra.mxu1 %v531_v35  ;;  %783 = vmatprep.mubr.msk.bf16.mxu1 %vm843_vm0, %v842_v0 }
 0x2b8   : > { %784 = vmatmul.mubr.msk.bf16.vlgmr.msra.gmra.mrb[12].mxu1 %vm174_vm1, %v524_v36 }
 0x373   : > { %v276_v37 = vpop.f32.mrb[0].mxu1 }
 0x374   : > { %v282_v38 = vpack.c.bf16 %v276_v37, %v276_v37  ;;  %v755_v39 = vpop.f32.mrb[1].mxu1 }
 0x375   : > { %v279_v40 = vpop.f32.mrb[2].mxu1 }
 0x376   : > { %284 = vst.msk [vmem:[%s942_s28] sm:$0xf] %vm283_vm4, %v282_v38  ;;  %v756_v41 = vpop.f32.mrb[3].mxu1 }
 0x37b   : > { %v329_v42 = vpop.f32.mrb[4].mxu1 }
 0x37c   : > { %v330_v43 = vadd.f32 %v329_v42, %v910_v10  ;;  %v761_v44 = vpop.f32.mrb[5].mxu1 }
 0x37d   : > { %v332_v45 = vpop.f32.mrb[6].mxu1 }
 0x37e   : > { %v762_v46 = vpop.f32.mrb[7].mxu1  ;;  %v335_v47 = vsel %vm174_vm1, %v330_v43, -inf }
 0x37f   : > { %336 = vmax.xlane.f32.xlu1 %v335_v47 }
 0x383   : > { %v448_v48 = vpop.f32.mrb[8].mxu1 }
 0x384   : > { %v449_v49 = vadd.f32 %v448_v48, %v910_v10  ;;  %v773_v50 = vpop.f32.mrb[9].mxu1 }
 0x385   : > { %v451_v51 = vpop.f32.mrb[10].mxu1 }
 0x386   : > { %v454_v52 = vsel %vm174_vm1, %v449_v49, -inf  ;;  %v774_v53 = vpop.f32.mrb[11].mxu1 }
 0x387   : > { %455 = vmax.xlane.f32.xlu0 %v454_v52 }
 0x38b   : > { %v567_v54 = vpop.f32.mrb[12].mxu1 }
 0x38c   : > { %v568_v55 = vadd.f32 %v567_v54, %v910_v10  ;;  %v785_v56 = vpop.f32.mrb[13].mxu1 }
 0x38d   : > { %v570_v57 = vpop.f32.mrb[14].mxu1 }
 0x38e   : > { %v573_v58 = vsel %vm174_vm1, %v568_v55, -inf  ;;  %v786_v59 = vpop.f32.mrb[15].mxu1 }
 0x38f   : > { %574 = vmax.xlane.f32.xlu1 %v573_v58 }
 0x40c   : > { %v337_v60 = vpop.xlane.xlu1 %336 }
 0x40d   : > { %v338_v61 = vsub.f32 %v330_v43, %v337_v60 }
 0x40f   : > { %v339_v62 = vmul.f32 1.442695, %v338_v61 }
 0x411   : > { %822 = vpow2.f32 %v339_v62 }
 0x414   : > { %v456_v8 = vpop.xlane.xlu0 %455 }
 0x415   : > { %v457_v9 = vsub.f32 %v449_v49, %v456_v8 }
 0x417   : > { %v458_v10 = vmul.f32 1.442695, %v457_v9 }
 0x41b   : > { %v823_v63 = vpop.eup %822 }
 0x41c   : > { %v575_v1 = vpop.xlane.xlu1 %574  ;;  %v341_v3 = vsel %vm174_vm1, %v823_v63, 0.0 }
 0x41d   : > { %v576_v4 = vsub.f32 %v568_v55, %v575_v1  ;;  %342 = vadd.xlane.f32.xlu1 %v341_v3 }
 0x41f   : > { %v577_v5 = vmul.f32 1.442695, %v576_v4 }
 0x421   : > { %824 = vpow2.f32 %v577_v5 }
 0x422   : > { %826 = vpow2.f32 %v458_v10 }
 0x42b   : > { %v825_v6 = vpop.eup %824 }
 0x42c   : > { %v579_v7 = vsel %vm174_vm1, %v825_v6, 0.0  ;;  %v827_v11 = vpop.eup %826 }
 0x42d   : > { %580 = vadd.xlane.f32.xlu0 %v579_v7  ;;  %v460_v12 = vsel %vm174_vm1, %v827_v11, 0.0 }
 0x42e   : > { %347 = vrot.lane.b32.xlu1 %v895_v2, %s852_s29 }
 0x443   : > { %466 = vrot.lane.b32.xlu0 %v895_v2, %s853_s30 }
 0x452   : > { %461 = vadd.xlane.f32.xlu1 %v460_v12 }
 0x463   : > { %585 = vrot.lane.b32.xlu1 %v895_v2, %s854_s3 }
 0x4aa   : > { %v343_v13 = vpop.xlane.xlu1 %342 }
 0x4ab   : > { %828 = vrcp.f32 %v343_v13 }
 0x4ae   : > { %v348_v14 = vpop.permute.xlu1 %347 }
 0x4af   : > { %v353_v15 = vsel %vm238_vm3, %v348_v14, 0 }
 0x4b0   : > { %764 = vmatpush3.bf16.msra.mxu0 %v353_v15 }
 0x4b1   : > { %775 = vmatprep.subr.bf16.mxu0 %v842_v0 }
 0x4b5   : > { %v829_v16 = vpop.eup %828 }
 0x4b6   : > { %v345_v17 = vmul.f32 %v829_v16, %v823_v63 }
 0x4b8   : > { %v346_v18 = vpack.c.bf16 %v345_v17, %v345_v17 }
 0x4ba   : > { %766 = vmatmul.mubr.msk.bf16.vlgmr.msra.gmra.mrb[4].mxu0 %vm174_vm1, %v346_v18  ;;  %v581_v19 = vpop.xlane.xlu0 %580 }
 0x4bb   : > { %777 = vmatprep.mubr.msk.bf16.mxu0 %vm843_vm0, %v842_v0 }
 0x4be   : > { %v467_v20 = vpop.permute.xlu0 %466 }
 0x4bf   : > { %v472_v2 = vsel %vm238_vm3, %v467_v20, 0 }
 0x4c0   : > { %776 = vmatpush3.bf16.msra.mxu0 %v472_v2 }
 0x4c1   : > { %787 = vmatprep.subr.bf16.mxu0 %v842_v0 }
 0x4df   : > { %v462_v21 = vpop.xlane.xlu1 %461 }
 0x4e0   : > { %830 = vrcp.f32 %v462_v21 }
 0x4e1   : > { %832 = vrcp.f32 %v581_v19 }
 0x4e3   : > { %v586_v23 = vpop.permute.xlu1 %585 }
 0x4e4   : > { %v591_v25 = vsel %vm238_vm3, %v586_v23, 0 }
 0x4ea   : > { %v831_v22 = vpop.eup %830 }
 0x4eb   : > { %v464_v24 = vmul.f32 %v831_v22, %v827_v11  ;;  %v833_v27 = vpop.eup %832 }
 0x4ec   : > { %v583_v28 = vmul.f32 %v833_v27, %v825_v6 }
 0x4ed   : > { %v465_v26 = vpack.c.bf16 %v464_v24, %v464_v24 }
 0x4ee   : > { %v584_v29 = vpack.c.bf16 %v583_v28, %v583_v28 }
 0x4ef   : > { %778 = vmatmul.mubr.msk.bf16.vlgmr.msra.gmra.mrb[8].mxu0 %vm174_vm1, %v465_v26 }
 0x4f0   : > { %788 = vmatpush3.bf16.msra.mxu0 %v591_v25  ;;  %789 = vmatprep.mubr.msk.bf16.mxu0 %vm843_vm0, %v842_v0 }
 0x4f7   : > { %790 = vmatmul.mubr.msk.bf16.vlgmr.msra.gmra.mrb[12].mxu0 %vm174_vm1, %v584_v29 }
 0x58d   : > { %v389_v30 = vpop.f32.mrb[4].mxu0 }
 0x58e   : > { %v726_v31 = vpack.c.bf16 %v389_v30, %v389_v30  ;;  %v767_v32 = vpop.f32.mrb[5].mxu0 }
 0x58f   : > { %v392_v33 = vpop.f32.mrb[6].mxu0 }
 0x590   : > { %399 = vrot.lane.b32.xlu1 %v726_v31, %s855_s4  ;;  %v768_v34 = vpop.f32.mrb[7].mxu0 }
 0x5c2   : > { %v508_v35 = vpop.f32.mrb[8].mxu0 }
 0x5c3   : > { %v727_v36 = vpack.c.bf16 %v508_v35, %v508_v35  ;;  %v779_v37 = vpop.f32.mrb[9].mxu0 }
 0x5c4   : > { %v511_v38 = vpop.f32.mrb[10].mxu0 }
 0x5c5   : > { %518 = vrot.lane.b32.xlu0 %v727_v36, %s856_s5  ;;  %v780_v0 = vpop.f32.mrb[11].mxu0 }
 0x5ca   : > { %v627_v39 = vpop.f32.mrb[12].mxu0 }
 0x5cb   : > { %v728_v40 = vpack.c.bf16 %v627_v39, %v627_v39  ;;  %v791_v41 = vpop.f32.mrb[13].mxu0 }
 0x5cc   : > { %v630_v42 = vpop.f32.mrb[14].mxu0 }
 0x5cd   : > { %637 = vrot.lane.b32.xlu1 %v728_v40, %s857_s6  ;;  %v792_v43 = vpop.f32.mrb[15].mxu0 }
 0x602   : > { %v400_v44 = vpop.permute.xlu1 %399 }
 0x603   : > { %403 = vst.msk [vmem:[%s942_s28] sm:$0xf] %vm402_vm5, %v400_v44 }
 0x637   : > { %v519_v45 = vpop.permute.xlu0 %518 }
 0x638   : > { %522 = vst.msk [vmem:[%s942_s28] sm:$0xf] %vm521_vm6, %v519_v45 }
 0x63f   : > { %v638_v46 = vpop.permute.xlu1 %637 }
 0x640   : > { %641 = vst.msk [vmem:[%s942_s28] sm:$0xf] %vm640_vm7, %v638_v46 }
 0x641 PF: > { %s12_s9 = sadd.s32 1, %s840_s9  }
 0x642   : > { %p9_p4 = scmp.ge.s32.totalorder %s12_s9, 4  }
 0x644   :  { %11 = sbr.rel (!%p9_p4) target bundleno = 1 (0x1), region = 61 }

// kernel: ocr_forward.23
= control target key start
LH: loop header
LB: loop body
LE: loop exit
PB: predicated region body
PF: predicated region fallthrough
CT: control target
= control target key end

     0   :  { %vm52_vm0 = vcmask 261120   ;;  %vm124_vm1 = vcmask 519168   ;;  %s211_s1 = inlined_call_operand.vmem [shape: bf16[32,64], index: 1, kind: input, shape index: {}]   ;;  %s212_s0 = inlined_call_operand.vmem [shape: bf16[32,32], index: 0, kind: input, shape index: {}]   ;;  %s213_s2 = inlined_call_operand.vmem [shape: f32[1,64], index: 2, kind: input, shape index: {}]   ;;  %s214_s3 = inlined_call_operand.vmem [shape: bf16[32,64], index: 3, kind: output, shape index: {}]  }
   0x1   :  { %v160_v0 = vld [vmem:[%s211_s1] sm:$0xff]   ;;  %v161_v1 = vld [vmem:[%s211_s1 + $0x8] sm:$0xff]  }
   0x2   :  { %152 = vmatprep.subr.bf16.mxu0 %v160_v0  ;;  %v162_v2 = vld [vmem:[%s212_s0] sm:$0xff]   ;;  %v163_v3 = vld [vmem:[%s212_s0 + $0x8] sm:$0xff]  }
   0x3   :  { %153 = vmatpush3.bf16.msra.mxu0 %v160_v0  ;;  %156 = vmatprep.mubr.msk.bf16.mxu0 %vm52_vm0, %v162_v2  ;;  %v133_v4 = vld [vmem:[%s213_s2] ss:$0 sm:$0xff] }
   0x4   :  { %154 = vmatprep.subr.bf16.mxu0 %v161_v1 }
   0x7   :  { %155 = vmatpush3.bf16.msra.mxu0 %v161_v1 }
   0xa   :  { %157 = vmatmul.mubr.msk.bf16.vlgmr.msra.gmra.mrb[0].mxu0 %vm52_vm0, %v163_v3 }
  0xdd   :  { %v158_v5 = vpop.f32.mrb[0].mxu0 }
  0xde   :  { %v102_v6 = vadd.f32 %v158_v5, %v133_v4  ;;  %v93_v7 = vpop.f32.mrb[1].mxu0 }
  0xdf   :  { %v94_v8 = vadd.f32 %v133_v4, %v93_v7  ;;  %v159_v9 = vpop.f32.mrb[2].mxu0 }
  0xe0   :  { %v146_v10 = vpack.c.bf16 %v102_v6, %v102_v6  ;;  %v105_v11 = vadd.f32 %v159_v9, %v133_v4  ;;  %v96_v12 = vpop.f32.mrb[3].mxu0 }
  0xe1   :  { %v144_v13 = vpack.c.bf16 %v94_v8, %v94_v8  ;;  %v97_v14 = vadd.f32 %v133_v4, %v96_v12 }
  0xe2   :  { %127 = vst.msk [vmem:[%s214_s3 + $0x8] sm:$0xf] %vm124_vm1, %v146_v10  ;;  %v147_v15 = vpack.c.bf16 %v105_v11, %v105_v11 }
  0xe3   :  { %125 = vst.msk [vmem:[%s214_s3] sm:$0xf] %vm124_vm1, %v144_v13  ;;  %v145_v16 = vpack.c.bf16 %v97_v14, %v97_v14 }
  0xe4   :  { %128 = vst.msk [vmem:[%s214_s3 + $0xc] sm:$0xf] %vm124_vm1, %v147_v15 }
  0xe5   :  { %126 = vst.msk [vmem:[%s214_s3 + $0x4] sm:$0xf] %vm124_vm1, %v145_v16 }

// kernel: ocr_forward.18
= control target key start
LH: loop header
LB: loop body
LE: loop exit
PB: predicated region body
PF: predicated region fallthrough
CT: control target
= control target key end

     0   :  { %vm185_vm0 = vcmask 261120   ;;  %vm275_vm1 = vcmask 257024   ;;  %s456_s1 = inlined_call_operand.vmem [shape: bf16[128,32], index: 1, kind: input, shape index: {}]   ;;  %s457_s0 = inlined_call_operand.vmem [shape: f32[32,128], index: 0, kind: input, shape index: {}]   ;;  %s458_s2 = inlined_call_operand.vmem [shape: f32[1,32], index: 2, kind: input, shape index: {}]   ;;  %s459_s3 = inlined_call_operand.vmem [shape: f32[1,32], index: 3, kind: input, shape index: {}]   ;;  %s460_s4 = inlined_call_operand.vmem [shape: f32[1,32], index: 4, kind: input, shape index: {}]   ;;  %s461_s5 = inlined_call_operand.vmem [shape: bf16[32,32], index: 5, kind: output, shape index: {}]  }
   0x1   :  { %v333_v0 = vld [vmem:[%s456_s1] sm:$0xff]   ;;  %v334_v1 = vld [vmem:[%s456_s1 + $0x8] sm:$0xff]   ;;  %v335_v2 = vld [vmem:[%s456_s1 + $0x10] sm:$0xff]  }
   0x2   :  { %313 = vmatprep.subr.bf16.mxu0 %v333_v0  ;;  %v336_v3 = vld [vmem:[%s456_s1 + $0x18] sm:$0xff]   ;;  %v21_v4 = vld [vmem:[%s457_s0] sm:$0xff]  ;;  %v22_v5 = vld [vmem:[%s457_s0 + $0x8] sm:$0xff] }
   0x3   :  { %314 = vmatpush3.bf16.msra.mxu0 %v333_v0  ;;  %v25_v6 = vpack.c.bf16 %v22_v5, %v21_v4  ;;  %v337_v7 = vld [vmem:[%s456_s1 + $0x20] sm:$0xff]   ;;  %v338_v8 = vld [vmem:[%s456_s1 + $0x28] sm:$0xff]   ;;  %v339_v9 = vld [vmem:[%s456_s1 + $0x30] sm:$0xff]  }
   0x4   :  { %315 = vmatprep.subr.bf16.mxu0 %v334_v1  ;;  %v340_v10 = vld [vmem:[%s456_s1 + $0x38] sm:$0xff]   ;;  %v23_v11 = vld [vmem:[%s457_s0 + $0x10] sm:$0xff]  ;;  %v284_v14 = vld [vmem:[%s458_s2] ss:$0 sm:$0xff] }
   0x5   :  { %329 = vmatprep.mubr.bf16.mxu0 %v25_v6  ;;  %v24_v12 = vld [vmem:[%s457_s0 + $0x18] sm:$0xff] }
   0x6   :  { %v26_v13 = vpack.c.bf16 %v24_v12, %v23_v11 }
   0x7   :  { %316 = vmatpush3.bf16.msra.mxu0 %v334_v1 }
   0x8   :  { %317 = vmatprep.subr.bf16.mxu0 %v335_v2 }
   0xb   :  { %318 = vmatpush3.bf16.msra.mxu0 %v335_v2 }
   0xc   :  { %319 = vmatprep.subr.bf16.mxu0 %v336_v3 }
   0xf   :  { %320 = vmatpush3.bf16.msra.mxu0 %v336_v3 }
  0x10   :  { %321 = vmatprep.subr.bf16.mxu0 %v337_v7 }
  0x13   :  { %322 = vmatpush3.bf16.msra.mxu0 %v337_v7 }
  0x14   :  { %323 = vmatprep.subr.bf16.mxu0 %v338_v8 }
  0x17   :  { %324 = vmatpush3.bf16.msra.mxu0 %v338_v8 }
  0x18   :  { %325 = vmatprep.subr.bf16.mxu0 %v339_v9 }
  0x1b   :  { %326 = vmatpush3.bf16.msra.mxu0 %v339_v9 }
  0x1c   :  { %327 = vmatprep.subr.bf16.mxu0 %v340_v10 }
  0x1f   :  { %328 = vmatpush3.bf16.msra.mxu0 %v340_v10 }
  0x22   :  { %330 = vmatmul.mubr.bf16.vlgmr.msra.gmra.mrb[0].mxu0 %v26_v13 }
  0xf5   :  { %v331_v15 = vpop.f32.mrb[0].mxu0 }
  0xf6   :  { %v141_v16 = vadd.f32 %v331_v15, %v284_v14  ;;  %v132_v17 = vpop.f32.mrb[1].mxu0 }
  0xf7   :  { %v133_v18 = vadd.f32 %v284_v14, %v132_v17  ;;  %v332_v19 = vpop.f32.mrb[2].mxu0 }
  0xf8   :  { %v153_v20 = vmul.f32 0.044715, %v141_v16  ;;  %v144_v21 = vadd.f32 %v332_v19, %v284_v14  ;;  %v135_v22 = vpop.f32.mrb[3].mxu0  ;;  %v149_v45 = vmul.f32 0.5, %v141_v16 }
  0xf9   :  { %v151_v23 = vmul.f32 0.044715, %v133_v18  ;;  %v136_v24 = vadd.f32 %v284_v14, %v135_v22  ;;  %v147_v48 = vmul.f32 0.5, %v133_v18 }
  0xfa   :  { %v154_v25 = vmul.f32 0.044715, %v144_v21  ;;  %v157_v26 = vmul.f32 %v153_v20, %v141_v16  ;;  %v150_v52 = vmul.f32 0.5, %v144_v21 }
  0xfb   :  { %v152_v27 = vmul.f32 0.044715, %v136_v24  ;;  %v155_v28 = vmul.f32 %v151_v23, %v133_v18  ;;  %v148_v55 = vmul.f32 0.5, %v136_v24 }
  0xfc   :  { %v161_v29 = vmul.f32 %v157_v26, %v141_v16  ;;  %v158_v30 = vmul.f32 %v154_v25, %v144_v21 }
  0xfd   :  { %v159_v31 = vmul.f32 %v155_v28, %v133_v18  ;;  %v156_v32 = vmul.f32 %v152_v27, %v136_v24 }
  0xfe   :  { %v165_v33 = vadd.f32 %v161_v29, %v141_v16  ;;  %v162_v34 = vmul.f32 %v158_v30, %v144_v21 }
  0xff   :  { %v163_v35 = vadd.f32 %v159_v31, %v133_v18  ;;  %v160_v36 = vmul.f32 %v156_v32, %v136_v24  ;;  %v293_v32 = vld [vmem:[%s459_s3] ss:$0 sm:$0xff] }
 0x100   :  { %v169_v37 = vmul.f32 0.7978846, %v165_v33  ;;  %v166_v38 = vadd.f32 %v162_v34, %v144_v21  ;;  %v294_v34 = vld [vmem:[%s460_s4] ss:$0 sm:$0xff] }
 0x101   :  { %v167_v39 = vmul.f32 0.7978846, %v163_v35  ;;  %v164_v40 = vadd.f32 %v160_v36, %v136_v24 }
 0x102   :  { %341 = vtanh.f32 %v169_v37  ;;  %v170_v41 = vmul.f32 0.7978846, %v166_v38 }
 0x103   :  { %343 = vtanh.f32 %v167_v39  ;;  %v168_v42 = vmul.f32 0.7978846, %v164_v40 }
 0x104   :  { %345 = vtanh.f32 %v170_v41 }
 0x105   :  { %347 = vtanh.f32 %v168_v42 }
 0x10c   :  { %v342_v43 = vpop.eup %341 }
 0x10d   :  { %v344_v44 = vpop.eup %343  ;;  %v177_v46 = vadd.f32 1.0, %v342_v43 }
 0x10e   :  { %v346_v47 = vpop.eup %345  ;;  %v175_v49 = vadd.f32 1.0, %v344_v44 }
 0x10f   :  { %v348_v50 = vpop.eup %347  ;;  %v181_v51 = vmul.f32 %v177_v46, %v149_v45  ;;  %v178_v53 = vadd.f32 1.0, %v346_v47 }
 0x110   :  { %v179_v54 = vmul.f32 %v175_v49, %v147_v48  ;;  %v176_v56 = vadd.f32 1.0, %v348_v50 }
 0x111   :  { %v192_v57 = vsel %vm185_vm0, %v181_v51, 0.0  ;;  %v182_v58 = vmul.f32 %v178_v53, %v150_v52 }
 0x112   :  { %193 = vadd.xlane.f32.xlu1 %v192_v57  ;;  %v186_v59 = vsel %vm185_vm0, %v179_v54, 0.0  ;;  %v180_v60 = vmul.f32 %v176_v56, %v148_v55 }
 0x113   :  { %187 = vadd.xlane.f32.xlu0 %v186_v59  ;;  %v195_v61 = vsel %vm185_vm0, %v182_v58, 0.0 }
 0x114   :  { %v189_v62 = vsel %vm185_vm0, %v180_v60, 0.0 }
 0x116   :  { %196 = vadd.xlane.f32.xlu1 %v195_v61 }
 0x117   :  { %190 = vadd.xlane.f32.xlu0 %v189_v62 }
 0x19f   :  { %v194_v63 = vpop.xlane.xlu1 %193 }
 0x1a0   :  { %v201_v0 = vmul.f32 0.03125, %v194_v63  ;;  %v188_v1 = vpop.xlane.xlu0 %187 }
 0x1a1   :  { %v199_v2 = vmul.f32 0.03125, %v188_v1 }
 0x1a2   :  { %v205_v3 = vsub.f32 %v181_v51, %v201_v0 }
 0x1a3   :  { %v203_v4 = vsub.f32 %v179_v54, %v199_v2  ;;  %v197_v5 = vpop.xlane.xlu1 %196 }
 0x1a4   :  { %v202_v6 = vmul.f32 0.03125, %v197_v5  ;;  %v191_v7 = vpop.xlane.xlu0 %190  ;;  %v209_v13 = vmul.f32 %v205_v3, %v205_v3 }
 0x1a5   :  { %v200_v8 = vmul.f32 0.03125, %v191_v7  ;;  %v207_v9 = vmul.f32 %v203_v4, %v203_v4 }
 0x1a6   :  { %v206_v10 = vsub.f32 %v182_v58, %v202_v6  ;;  %v217_v15 = vsel %vm185_vm0, %v209_v13, 0.0 }
 0x1a7   :  { %v204_v11 = vsub.f32 %v180_v60, %v200_v8  ;;  %v211_v12 = vsel %vm185_vm0, %v207_v9, 0.0 }
 0x1a8   :  { %212 = vadd.xlane.f32.xlu0 %v211_v12  ;;  %v210_v17 = vmul.f32 %v206_v10, %v206_v10 }
 0x1a9   :  { %v208_v14 = vmul.f32 %v204_v11, %v204_v11 }
 0x1aa   :  { %v220_v18 = vsel %vm185_vm0, %v210_v17, 0.0 }
 0x1ab   :  { %v214_v16 = vsel %vm185_vm0, %v208_v14, 0.0 }
 0x1ac   :  { %218 = vadd.xlane.f32.xlu0 %v217_v15  ;;  %215 = vadd.xlane.f32.xlu1 %v214_v16 }
 0x1b0   :  { %221 = vadd.xlane.f32.xlu1 %v220_v18 }
 0x235   :  { %v213_v19 = vpop.xlane.xlu0 %212 }
 0x236   :  { %v223_v20 = vmul.f32 0.03125, %v213_v19 }
 0x238   :  { %v227_v21 = vadd.f32 1e-05, %v223_v20 }
 0x239   :  { %v216_v22 = vpop.xlane.xlu1 %215  ;;  %v219_v23 = vpop.xlane.xlu0 %218 }
 0x23a   :  { %349 = vrsqrt.f32 %v227_v21  ;;  %v224_v24 = vmul.f32 0.03125, %v216_v22  ;;  %v225_v25 = vmul.f32 0.03125, %v219_v23 }
 0x23c   :  { %v228_v26 = vadd.f32 1e-05, %v224_v24  ;;  %v229_v27 = vadd.f32 1e-05, %v225_v25 }
 0x23d   :  { %v222_v28 = vpop.xlane.xlu1 %221 }
 0x23e   :  { %351 = vrsqrt.f32 %v228_v26  ;;  %v226_v29 = vmul.f32 0.03125, %v222_v28 }
 0x23f   :  { %353 = vrsqrt.f32 %v229_v27 }
 0x240   :  { %v230_v30 = vadd.f32 1e-05, %v226_v29 }
 0x242   :  { %355 = vrsqrt.f32 %v230_v30 }
 0x244   :  { %v350_v31 = vpop.eup %349 }
 0x245   :  { %v235_v33 = vmul.f32 %v350_v31, %v203_v4 }
 0x247   :  { %v245_v35 = vmul.f32 %v293_v32, %v235_v33 }
 0x248   :  { %v352_v36 = vpop.eup %351 }
 0x249   :  { %v354_v37 = vpop.eup %353  ;;  %v255_v38 = vadd.f32 %v294_v34, %v245_v35  ;;  %v236_v39 = vmul.f32 %v352_v36, %v204_v11 }
 0x24a   :  { %v237_v40 = vmul.f32 %v354_v37, %v205_v3 }
 0x24b   :  { %v299_v41 = vpack.c.bf16 %v255_v38, %v255_v38  ;;  %v246_v42 = vmul.f32 %v293_v32, %v236_v39 }
 0x24c   :  { %v356_v43 = vpop.eup %355  ;;  %v247_v44 = vmul.f32 %v293_v32, %v237_v40 }
 0x24d   :  { %276 = vst.msk [vmem:[%s461_s5] sm:$0xf] %vm275_vm1, %v299_v41  ;;  %v256_v45 = vadd.f32 %v294_v34, %v246_v42  ;;  %v238_v46 = vmul.f32 %v356_v43, %v206_v10 }
 0x24e   :  { %v257_v47 = vadd.f32 %v294_v34, %v247_v44 }
 0x24f   :  { %v300_v48 = vpack.c.bf16 %v256_v45, %v256_v45  ;;  %v248_v49 = vmul.f32 %v293_v32, %v238_v46 }
 0x250   :  { %v301_v50 = vpack.c.bf16 %v257_v47, %v257_v47 }
 0x251   :  { %277 = vst.msk [vmem:[%s461_s5 + $0x4] sm:$0xf] %vm275_vm1, %v300_v48  ;;  %v258_v51 = vadd.f32 %v294_v34, %v248_v49 }
 0x252   :  { %278 = vst.msk [vmem:[%s461_s5 + $0x8] sm:$0xf] %vm275_vm1, %v301_v50 }
 0x253   :  { %v302_v52 = vpack.c.bf16 %v258_v51, %v258_v51 }
 0x255   :  { %279 = vst.msk [vmem:[%s461_s5 + $0xc] sm:$0xf] %vm275_vm1, %v302_v52 }

// kernel: ocr_forward.24
= control target key start
LH: loop header
LB: loop body
LE: loop exit
PB: predicated region body
PF: predicated region fallthrough
CT: control target
= control target key end

     0   :  { %s861_s9 = smov 0   ;;  %s949_s0 = inlined_call_operand.vmem [shape: bf16[2,8,32], index: 0, kind: input, shape index: {}]   ;;  %s950_s1 = inlined_call_operand.vmem [shape: bf16[2,16,64], index: 1, kind: input, shape index: {}]   ;;  %s951_s2 = inlined_call_operand.vmem [shape: bf16[2,8,32], index: 2, kind: output, shape index: {}]  }
   0x1 LB: > { %s696_s10 = sadd.s32 4294967295, %s832_s9   ;;  %p700_p0 = scmp.ge.s32.totalorder %s832_s9, 1  ;;  %s832_s9 = sphi %s861_s9, %s12_s9  }
   0x2   : > { %p121_p1 = scmp.lt.s32.totalorder %s832_s9, 3 }
   0x4   : > { %p122_p2 = pnand %p700_p0, %p121_p1 }
   0x5   : > { %p146_p3 = scmp.lt.s32.totalorder (!%p122_p2), %s696_s10, 1  ;;  %v834_v0 = vmov (!%p122_p2), 0.0   ;;  %vm835_vm0 = vmmov (!%p122_p2), 0   ;;  %vm168_vm1 = vcmask (!%p122_p2), 64512   ;;  %vm215_vm2 = vcmask (!%p122_p2), 130048   ;;  %s836_s19 = smov (!%p122_p2), 96  }
   0x6   : > { %125 = sbr.rel (%p122_p2) target bundleno = 1435 (0x59b), region = 28  ;;  %740 = vmatprep.subr.bf16.mxu0 (!%p122_p2), %v834_v0  ;;  %742 = vmatprep.mubr.msk.bf16.mxu0 (!%p122_p2), %vm835_vm0, %v834_v0  ;;  %s837_s20 = smov (!%p122_p2), 120   ;;  %vm275_vm3 = vcmask (!%p122_p2), 60416   ;;  %vm395_vm4 = vcmask (!%p122_p2), 126016   ;;  %vm512_vm5 = vcmask (!%p122_p2), 191616   ;;  %vm629_vm6 = vcmask (!%p122_p2), 257216  }
   0x7   : > { %746 = vmatprep.subr.bf16.mxu1 (!%p122_p2), %v834_v0  ;;  %748 = vmatprep.mubr.msk.bf16.mxu1 (!%p122_p2), %vm835_vm0, %v834_v0  ;;  %s838_s21 = smov (!%p122_p2), 112   ;;  %s839_s22 = smov (!%p122_p2), 104  }
   0x8   : > { %s840_s26 = smov (!%p122_p2), 88   ;;  %s841_s27 = smov (!%p122_p2), 72  }
   0x9   : > { %s842_s28 = smov (!%p122_p2), 80   ;;  %s843_s29 = smov (!%p122_p2), 8  }
   0xa   : > { %s844_s30 = smov (!%p122_p2), 16   ;;  %s845_s3 = smov (!%p122_p2), 24  }
   0xd   : > { %s953_s10 = smov (!%p146_p3, %s696_s10), 1 }
   0xe   : > { %s720_s11 = sshll.u32 %s953_s10, 3  ;;  %s701_s15 = sshll.u32 %s953_s10, 2 }
   0xf   : > { %s154_s14 = scalar_lea.vmem %s950_s1, %s720_s11  ;;  %s149_s18 = scalar_lea.vmem %s949_s0, %s701_s15 }
  0x10   : > { %v881_v1 = vld [vmem:[%s154_s14] sm:$0xff]   ;;  %s922_s25 = scalar_lea.vmem %s951_s2, %s701_s15 }
  0x11   : > { %v173_v2 = vsel %vm168_vm1, %v881_v1, 0  ;;  %v162_v3 = vld [vmem:[%s149_s18] sm:$0xf]  ;;  %228 = vrot.lane.b32.xlu1 %v881_v1, %s836_s19 }
  0x12   : > { %741 = vmatpush3.bf16.xpose.msra.mxu0 %v173_v2  ;;  %v708_v9 = vcombine.low %v162_v3, %v162_v3 }
  0x13   : > { %758 = vmatprep.subr.bf16.mxu0 %v834_v0 }
  0x15   : > { %282 = vrot.lane.b32.xlu1 %v881_v1, %s837_s20 }
  0x19   : > { %743 = vmatmul.mubr.msk.bf16.vlgmr.msra.gmra.mrb[0].mxu0 %vm168_vm1, %v162_v3  ;;  %399 = vrot.lane.b32.xlu1 %v881_v1, %s838_s21 }
  0x1a   : > { %760 = vmatprep.mubr.msk.bf16.mxu0 %vm835_vm0, %v834_v0 }
  0x1d   : > { %397 = vrot.lane.b32.xlu1 %v708_v9, %s838_s21 }
  0x21   : > { %516 = vrot.lane.b32.xlu1 %v881_v1, %s839_s22 }
  0x25   : > { %514 = vrot.lane.b32.xlu1 %v708_v9, %s839_s22 }
  0x83   : > { %v229_v15 = vpop.permute.xlu1 %228 }
  0x84   : > { %747 = vmatpush3.bf16.msra.mxu1 %v229_v15 }
  0x85   : > { %752 = vmatprep.subr.bf16.mxu1 %v834_v0 }
  0x87   : > { %v283_v18 = vpop.permute.xlu1 %282 }
  0x88   : > { %v288_v20 = vsel %vm168_vm1, %v283_v18, 0 }
  0x8b   : > { %v400_v22 = vpop.permute.xlu1 %399 }
  0x8c   : > { %v405_v25 = vsel %vm168_vm1, %v400_v22, 0 }
  0x8f   : > { %v398_v24 = vpop.permute.xlu1 %397 }
  0x93   : > { %v517_v26 = vpop.permute.xlu1 %516 }
  0x94   : > { %v522_v27 = vsel %vm168_vm1, %v517_v26, 0 }
  0x97   : > { %v515_v28 = vpop.permute.xlu1 %514 }
  0xec   : > { %v209_v4 = vpop.f32.mrb[0].mxu0 }
  0xed   : > { %v744_v5 = vpop.f32.mrb[1].mxu0  ;;  %v216_v6 = vsel %vm215_vm2, %v209_v4, -inf }
  0xee   : > { %217 = vmax.xlane.f32.xlu0 %v216_v6  ;;  %v212_v7 = vpop.f32.mrb[2].mxu0 }
  0xef   : > { %v745_v8 = vpop.f32.mrb[3].mxu0 }
 0x17b   : > { %v218_v10 = vpop.xlane.xlu0 %217 }
 0x17c   : > { %v219_v11 = vsub.f32 %v209_v4, %v218_v10 }
 0x17e   : > { %v220_v12 = vmul.f32 1.442695, %v219_v11 }
 0x180   : > { %810 = vpow2.f32 %v220_v12 }
 0x18a   : > { %v811_v13 = vpop.eup %810 }
 0x18b   : > { %v222_v14 = vsel %vm215_vm2, %v811_v13, 0.0 }
 0x18c   : > { %223 = vadd.xlane.f32.xlu0 %v222_v14 }
 0x1a2   : > { %280 = vrot.lane.b32.xlu0 %v708_v9, %s837_s20 }
 0x219   : > { %v224_v16 = vpop.xlane.xlu0 %223 }
 0x21a   : > { %812 = vrcp.f32 %v224_v16 }
 0x21d   : > { %v281_v23 = vpop.permute.xlu0 %280 }
 0x224   : > { %v813_v17 = vpop.eup %812 }
 0x225   : > { %v226_v19 = vmul.f32 %v813_v17, %v811_v13 }
 0x227   : > { %v227_v21 = vpack.c.bf16 %v226_v19, %v226_v19 }
 0x229   : > { %749 = vmatmul.mubr.msk.bf16.vlgmr.msra.gmra.mrb[0].mxu1 %vm215_vm2, %v227_v21 }
 0x22a   : > { %753 = vmatpush3.bf16.xpose.msra.mxu1 %v288_v20  ;;  %754 = vmatprep.mubr.msk.bf16.mxu1 %vm835_vm0, %v834_v0 }
 0x22b   : > { %764 = vmatprep.subr.bf16.mxu1 %v834_v0 }
 0x231   : > { %755 = vmatmul.mubr.msk.bf16.vlgmr.msra.gmra.mrb[4].mxu1 %vm168_vm1, %v281_v23 }
 0x232   : > { %765 = vmatpush3.bf16.xpose.msra.mxu1 %v405_v25  ;;  %766 = vmatprep.mubr.msk.bf16.mxu1 %vm835_vm0, %v834_v0 }
 0x233   : > { %776 = vmatprep.subr.bf16.mxu1 %v834_v0 }
 0x239   : > { %767 = vmatmul.mubr.msk.bf16.vlgmr.msra.gmra.mrb[8].mxu1 %vm168_vm1, %v398_v24 }
 0x23a   : > { %777 = vmatpush3.bf16.xpose.msra.mxu1 %v522_v27  ;;  %778 = vmatprep.mubr.msk.bf16.mxu1 %vm835_vm0, %v834_v0 }
 0x241   : > { %779 = vmatmul.mubr.msk.bf16.vlgmr.msra.gmra.mrb[12].mxu1 %vm168_vm1, %v515_v28 }
 0x2fc   : > { %v268_v29 = vpop.f32.mrb[0].mxu1 }
 0x2fd   : > { %v274_v30 = vpack.c.bf16 %v268_v29, %v268_v29  ;;  %v750_v31 = vpop.f32.mrb[1].mxu1 }
 0x2fe   : > { %v271_v32 = vpop.f32.mrb[2].mxu1 }
 0x2ff   : > { %276 = vst.msk [vmem:[%s922_s25] sm:$0xf] %vm275_vm3, %v274_v30  ;;  %v751_v33 = vpop.f32.mrb[3].mxu1 }
 0x304   : > { %v324_v34 = vpop.f32.mrb[4].mxu1 }
 0x305   : > { %v756_v35 = vpop.f32.mrb[5].mxu1  ;;  %v330_v36 = vsel %vm215_vm2, %v324_v34, -inf }
 0x306   : > { %331 = vmax.xlane.f32.xlu1 %v330_v36  ;;  %v327_v37 = vpop.f32.mrb[6].mxu1 }
 0x307   : > { %v757_v38 = vpop.f32.mrb[7].mxu1 }
 0x30c   : > { %v441_v39 = vpop.f32.mrb[8].mxu1 }
 0x30d   : > { %v768_v40 = vpop.f32.mrb[9].mxu1  ;;  %v447_v41 = vsel %vm215_vm2, %v441_v39, -inf }
 0x30e   : > { %448 = vmax.xlane.f32.xlu0 %v447_v41  ;;  %v444_v42 = vpop.f32.mrb[10].mxu1 }
 0x30f   : > { %v769_v43 = vpop.f32.mrb[11].mxu1 }
 0x314   : > { %v558_v44 = vpop.f32.mrb[12].mxu1 }
 0x315   : > { %v780_v45 = vpop.f32.mrb[13].mxu1  ;;  %v564_v46 = vsel %vm215_vm2, %v558_v44, -inf }
 0x316   : > { %565 = vmax.xlane.f32.xlu1 %v564_v46  ;;  %v561_v47 = vpop.f32.mrb[14].mxu1 }
 0x317   : > { %v781_v48 = vpop.f32.mrb[15].mxu1 }
 0x327   : > { %342 = vrot.lane.b32.xlu1 %v881_v1, %s840_s26 }
 0x393   : > { %v332_v49 = vpop.xlane.xlu1 %331 }
 0x394   : > { %v333_v50 = vsub.f32 %v324_v34, %v332_v49 }
 0x396   : > { %v334_v51 = vmul.f32 1.442695, %v333_v50 }
 0x398   : > { %814 = vpow2.f32 %v334_v51 }
 0x39b   : > { %v449_v52 = vpop.xlane.xlu0 %448 }
 0x39c   : > { %v450_v53 = vsub.f32 %v441_v39, %v449_v52 }
 0x39e   : > { %v451_v54 = vmul.f32 1.442695, %v450_v53 }
 0x3a0   : > { %816 = vpow2.f32 %v451_v54 }
 0x3a2   : > { %v815_v55 = vpop.eup %814 }
 0x3a3   : > { %v566_v56 = vpop.xlane.xlu1 %565  ;;  %v336_v57 = vsel %vm215_vm2, %v815_v55, 0.0 }
 0x3a4   : > { %v567_v58 = vsub.f32 %v558_v44, %v566_v56  ;;  %337 = vadd.xlane.f32.xlu0 %v336_v57 }
 0x3a6   : > { %v568_v59 = vmul.f32 1.442695, %v567_v58 }
 0x3a7   : > { %v343_v60 = vpop.permute.xlu1 %342 }
 0x3a8   : > { %818 = vpow2.f32 %v568_v59  ;;  %759 = vmatpush3.bf16.msra.mxu0 %v343_v60 }
 0x3a9   : > { %770 = vmatprep.subr.bf16.mxu0 %v834_v0 }
 0x3aa   : > { %v817_v61 = vpop.eup %816 }
 0x3ab   : > { %v453_v62 = vsel %vm215_vm2, %v817_v61, 0.0 }
 0x3ac   : > { %454 = vadd.xlane.f32.xlu1 %v453_v62 }
 0x3b2   : > { %v819_v63 = vpop.eup %818 }
 0x3b3   : > { %v570_v2 = vsel %vm215_vm2, %v819_v63, 0.0 }
 0x3b4   : > { %571 = vadd.xlane.f32.xlu0 %v570_v2 }
 0x3bd   : > { %576 = vrot.lane.b32.xlu1 %v881_v1, %s841_s27 }
 0x3ca   : > { %459 = vrot.lane.b32.xlu0 %v881_v1, %s842_s28 }
 0x431   : > { %v338_v3 = vpop.xlane.xlu0 %337 }
 0x432   : > { %820 = vrcp.f32 %v338_v3 }
 0x439   : > { %v455_v4 = vpop.xlane.xlu1 %454 }
 0x43a   : > { %822 = vrcp.f32 %v455_v4 }
 0x43c   : > { %v821_v5 = vpop.eup %820 }
 0x43d   : > { %v340_v6 = vmul.f32 %v821_v5, %v815_v55  ;;  %v577_v1 = vpop.permute.xlu1 %576 }
 0x43f   : > { %v341_v7 = vpack.c.bf16 %v340_v6, %v340_v6 }
 0x441   : > { %v572_v8 = vpop.xlane.xlu0 %571  ;;  %761 = vmatmul.mubr.msk.bf16.vlgmr.msra.gmra.mrb[4].mxu0 %vm215_vm2, %v341_v7 }
 0x442   : > { %824 = vrcp.f32 %v572_v8  ;;  %772 = vmatprep.mubr.msk.bf16.mxu0 %vm835_vm0, %v834_v0 }
 0x444   : > { %v823_v9 = vpop.eup %822 }
 0x445   : > { %v457_v10 = vmul.f32 %v823_v9, %v817_v61  ;;  %v460_v11 = vpop.permute.xlu0 %459 }
 0x446   : > { %771 = vmatpush3.bf16.msra.mxu0 %v460_v11 }
 0x447   : > { %v458_v12 = vpack.c.bf16 %v457_v10, %v457_v10  ;;  %782 = vmatprep.subr.bf16.mxu0 %v834_v0 }
 0x449   : > { %773 = vmatmul.mubr.msk.bf16.vlgmr.msra.gmra.mrb[8].mxu0 %vm215_vm2, %v458_v12 }
 0x44a   : > { %783 = vmatpush3.bf16.msra.mxu0 %v577_v1  ;;  %784 = vmatprep.mubr.msk.bf16.mxu0 %vm835_vm0, %v834_v0 }
 0x44c   : > { %v825_v13 = vpop.eup %824 }
 0x44d   : > { %v574_v14 = vmul.f32 %v825_v13, %v819_v63 }
 0x44f   : > { %v575_v15 = vpack.c.bf16 %v574_v14, %v574_v14 }
 0x451   : > { %785 = vmatmul.mubr.msk.bf16.vlgmr.msra.gmra.mrb[12].mxu0 %vm215_vm2, %v575_v15 }
 0x514   : > { %v382_v16 = vpop.f32.mrb[4].mxu0 }
 0x515   : > { %v721_v17 = vpack.c.bf16 %v382_v16, %v382_v16  ;;  %v762_v18 = vpop.f32.mrb[5].mxu0 }
 0x516   : > { %v385_v19 = vpop.f32.mrb[6].mxu0 }
 0x517   : > { %392 = vrot.lane.b32.xlu1 %v721_v17, %s843_s29  ;;  %v763_v20 = vpop.f32.mrb[7].mxu0 }
 0x51c   : > { %v499_v21 = vpop.f32.mrb[8].mxu0 }
 0x51d   : > { %v722_v22 = vpack.c.bf16 %v499_v21, %v499_v21  ;;  %v774_v23 = vpop.f32.mrb[9].mxu0 }
 0x51e   : > { %v502_v24 = vpop.f32.mrb[10].mxu0 }
 0x51f   : > { %509 = vrot.lane.b32.xlu0 %v722_v22, %s844_s30  ;;  %v775_v0 = vpop.f32.mrb[11].mxu0 }
 0x524   : > { %v616_v25 = vpop.f32.mrb[12].mxu0 }
 0x525   : > { %v723_v26 = vpack.c.bf16 %v616_v25, %v616_v25  ;;  %v786_v27 = vpop.f32.mrb[13].mxu0 }
 0x526   : > { %v619_v28 = vpop.f32.mrb[14].mxu0 }
 0x527   : > { %626 = vrot.lane.b32.xlu1 %v723_v26, %s845_s3  ;;  %v787_v29 = vpop.f32.mrb[15].mxu0 }
 0x589   : > { %v393_v30 = vpop.permute.xlu1 %392 }
 0x58a   : > { %396 = vst.msk [vmem:[%s922_s25] sm:$0xf] %vm395_vm4, %v393_v30 }
 0x591   : > { %v510_v31 = vpop.permute.xlu0 %509 }
 0x592   : > { %513 = vst.msk [vmem:[%s922_s25] sm:$0xf] %vm512_vm5, %v510_v31 }
 0x599   : > { %v627_v32 = vpop.permute.xlu1 %626 }
 0x59a   : > { %630 = vst.msk [vmem:[%s922_s25] sm:$0xf] %vm629_vm6, %v627_v32 }
 0x59b PF: > { %s12_s9 = sadd.s32 1, %s832_s9  }
 0x59c   : > { %p9_p4 = scmp.ge.s32.totalorder %s12_s9, 4  }
 0x59e   :  { %11 = sbr.rel (!%p9_p4) target bundleno = 1 (0x1), region = 61 }

// kernel: ocr_forward.35
= control target key start
LH: loop header
LB: loop body
LE: loop exit
PB: predicated region body
PF: predicated region fallthrough
CT: control target
= control target key end

     0   :  { %v111_v0 = vmov 0.0   ;;  %vm112_vm0 = vmmov 0   ;;  %vm41_vm1 = vcmask 261120   ;;  %s154_s1 = inlined_call_operand.vmem [shape: bf16[32,128], index: 1, kind: input, shape index: {}]   ;;  %s155_s0 = inlined_call_operand.vmem [shape: f32[16,32], index: 0, kind: input, shape index: {}]   ;;  %s156_s2 = inlined_call_operand.vmem [shape: f32[1,128], index: 2, kind: input, shape index: {}]   ;;  %s157_s3 = inlined_call_operand.vmem [shape: f32[16,128], index: 3, kind: output, shape index: {}]  }
   0x1   :  { %99 = vmatprep.subr.bf16.mxu0 %v111_v0  ;;  %v109_v1 = vld [vmem:[%s154_s1] sm:$0xff]   ;;  %103 = vmatprep.mubr.msk.bf16.mxu0 %vm112_vm0, %v111_v0  ;;  %v110_v2 = vld [vmem:[%s154_s1 + $0x8] sm:$0xff]  }
   0x2   :  { %100 = vmatpush3.bf16.msra.mxu0 %v109_v1  ;;  %v15_v3 = vld [vmem:[%s155_s0] sm:$0xff]  ;;  %v16_v4 = vld [vmem:[%s155_s0 + $0x8] sm:$0xff] }
   0x3   :  { %101 = vmatprep.subr.bf16.mxu0 %v111_v0  ;;  %v17_v5 = vpack.c.bf16 %v16_v4, %v15_v3  ;;  %v92_v6 = vld [vmem:[%s156_s2] ss:$0 sm:$0xff] }
   0x6   :  { %102 = vmatpush3.bf16.msra.mxu0 %v110_v2 }
   0x9   :  { %104 = vmatmul.mubr.msk.bf16.vlgmr.msra.gmra.mrb[0].mxu0 %vm41_vm1, %v17_v5 }
  0xdc   :  { %v79_v7 = vpop.f32.mrb[0].mxu0 }
  0xdd   :  { %v80_v8 = vadd.f32 %v92_v6, %v79_v7  ;;  %v105_v9 = vpop.f32.mrb[1].mxu0 }
  0xde   :  { %v82_v10 = vpop.f32.mrb[2].mxu0 }
  0xdf   :  { %86 = vst [vmem:[%s157_s3] sm:$0xff] %v80_v8  ;;  %v83_v11 = vadd.f32 %v92_v6, %v82_v10  ;;  %v106_v12 = vpop.f32.mrb[3].mxu0 }
  0xe1   :  { %87 = vst [vmem:[%s157_s3 + $0x8] sm:$0xff] %v83_v11 }

// kernel: ocr_forward.26
= control target key start
LH: loop header
LB: loop body
LE: loop exit
PB: predicated region body
PF: predicated region fallthrough
CT: control target
= control target key end

     0   :  { %v290_v0 = vmov 0.0   ;;  %vm291_vm0 = vmmov 0   ;;  %vm53_vm1 = vcmask 261120   ;;  %vm140_vm2 = vcmask 523264   ;;  %s381_s1 = inlined_call_operand.vmem [shape: bf16[32,64], index: 1, kind: input, shape index: {}]   ;;  %s382_s0 = inlined_call_operand.vmem [shape: f32[16,32], index: 0, kind: input, shape index: {}]   ;;  %s383_s3 = inlined_call_operand.vmem [shape: bf16[64,32], index: 3, kind: input, shape index: {}]   ;;  %s384_s2 = inlined_call_operand.vmem [shape: f32[1,64], index: 2, kind: input, shape index: {}]   ;;  %s385_s4 = inlined_call_operand.vmem [shape: f32[1,32], index: 4, kind: input, shape index: {}]   ;;  %s386_s5 = inlined_call_operand.vmem [shape: f32[1,32], index: 5, kind: input, shape index: {}]   ;;  %s387_s6 = inlined_call_operand.vmem [shape: f32[1,32], index: 6, kind: input, shape index: {}]   ;;  %s388_s7 = inlined_call_operand.vmem [shape: f32[16,32], index: 7, kind: output, shape index: {}]  }
   0x1   :  { %258 = vmatprep.subr.bf16.mxu0 %v290_v0  ;;  %v280_v1 = vld [vmem:[%s381_s1] sm:$0xff]   ;;  %262 = vmatprep.mubr.msk.bf16.mxu0 %vm291_vm0, %v290_v0  ;;  %v281_v2 = vld [vmem:[%s381_s1 + $0x8] sm:$0xff]   ;;  %v284_v8 = vld [vmem:[%s383_s3 + $0x10] sm:$0xff]  }
   0x2   :  { %266 = vmatprep.subr.bf16.mxu1 %v290_v0  ;;  %274 = vmatprep.mubr.msk.bf16.mxu1 %vm291_vm0, %v290_v0  ;;  %v27_v3 = vld [vmem:[%s382_s0] sm:$0xff]  ;;  %v28_v4 = vld [vmem:[%s382_s0 + $0x8] sm:$0xff]  ;;  %v285_v9 = vld [vmem:[%s383_s3 + $0x18] sm:$0xff]  }
   0x3   :  { %259 = vmatpush3.bf16.msra.mxu0 %v280_v1  ;;  %v282_v5 = vld [vmem:[%s383_s3] sm:$0xff]   ;;  %v283_v6 = vld [vmem:[%s383_s3 + $0x8] sm:$0xff]   ;;  %v29_v7 = vpack.c.bf16 %v28_v4, %v27_v3 }
   0x4   :  { %260 = vmatprep.subr.bf16.mxu0 %v290_v0  ;;  %267 = vmatpush3.bf16.msra.mxu1 %v282_v5  ;;  %v238_v10 = vld [vmem:[%s384_s2] ss:$0 sm:$0xff] }
   0x5   :  { %268 = vmatprep.subr.bf16.mxu1 %v290_v0  ;;  %v242_v20 = vld [vmem:[%s385_s4] ss:$0 sm:$0xff] }
   0x6   :  { %v248_v48 = vld [vmem:[%s386_s5] ss:$0 sm:$0xff] }
   0x7   :  { %261 = vmatpush3.bf16.msra.mxu0 %v281_v2  ;;  %v249_v50 = vld [vmem:[%s387_s6] ss:$0 sm:$0xff] }
   0x8   :  { %269 = vmatpush3.bf16.msra.mxu1 %v283_v6 }
   0x9   :  { %270 = vmatprep.subr.bf16.mxu1 %v290_v0 }
   0xa   :  { %263 = vmatmul.mubr.msk.bf16.vlgmr.msra.gmra.mrb[0].mxu0 %vm53_vm1, %v29_v7 }
   0xc   :  { %271 = vmatpush3.bf16.msra.mxu1 %v284_v8 }
   0xd   :  { %272 = vmatprep.subr.bf16.mxu1 %v290_v0 }
  0x10   :  { %273 = vmatpush3.bf16.msra.mxu1 %v285_v9 }
  0xdd   :  { %v91_v11 = vpop.f32.mrb[0].mxu0 }
  0xde   :  { %v92_v12 = vadd.f32 %v238_v10, %v91_v11  ;;  %v264_v13 = vpop.f32.mrb[1].mxu0 }
  0xdf   :  { %v94_v14 = vpop.f32.mrb[2].mxu0 }
  0xe0   :  { %v95_v15 = vadd.f32 %v238_v10, %v94_v14  ;;  %v265_v16 = vpop.f32.mrb[3].mxu0  ;;  %v98_v17 = vmax.f32 %v92_v12, 0.0 }
  0xe2   :  { %v99_v18 = vmax.f32 %v95_v15, 0.0 }
  0xe4   :  { %v100_v19 = vpack.c.bf16 %v99_v18, %v98_v17 }
  0xe6   :  { %275 = vmatmul.mubr.msk.bf16.vlgmr.msra.gmra.mrb[0].mxu1 %vm140_vm2, %v100_v19 }
 0x1b9   :  { %v178_v21 = vpop.f32.mrb[0].mxu1 }
 0x1ba   :  { %v179_v22 = vadd.f32 %v242_v20, %v178_v21  ;;  %v276_v23 = vpop.f32.mrb[1].mxu1 }
 0x1bb   :  { %v181_v24 = vpop.f32.mrb[2].mxu1 }
 0x1bc   :  { %v182_v25 = vadd.f32 %v242_v20, %v181_v24  ;;  %v277_v26 = vpop.f32.mrb[3].mxu1  ;;  %v185_v27 = vadd.f32 %v179_v22, %v27_v3 }
 0x1be   :  { %v189_v28 = vsel %vm53_vm1, %v185_v27, 0.0  ;;  %v186_v29 = vadd.f32 %v182_v25, %v28_v4 }
 0x1bf   :  { %190 = vadd.xlane.f32.xlu0 %v189_v28 }
 0x1c0   :  { %v192_v30 = vsel %vm53_vm1, %v186_v29, 0.0 }
 0x1c3   :  { %193 = vadd.xlane.f32.xlu0 %v192_v30 }
 0x24c   :  { %v191_v31 = vpop.xlane.xlu0 %190 }
 0x24d   :  { %v196_v32 = vmul.f32 0.03125, %v191_v31 }
 0x24f   :  { %v198_v33 = vsub.f32 %v185_v27, %v196_v32 }
 0x250   :  { %v194_v34 = vpop.xlane.xlu0 %193 }
 0x251   :  { %v197_v35 = vmul.f32 0.03125, %v194_v34  ;;  %v200_v36 = vmul.f32 %v198_v33, %v198_v33 }
 0x253   :  { %v199_v37 = vsub.f32 %v186_v29, %v197_v35  ;;  %v202_v38 = vsel %vm53_vm1, %v200_v36, 0.0 }
 0x254   :  { %203 = vadd.xlane.f32.xlu1 %v202_v38 }
 0x255   :  { %v201_v39 = vmul.f32 %v199_v37, %v199_v37 }
 0x257   :  { %v205_v40 = vsel %vm53_vm1, %v201_v39, 0.0 }
 0x258   :  { %206 = vadd.xlane.f32.xlu1 %v205_v40 }
 0x2e1   :  { %v204_v41 = vpop.xlane.xlu1 %203 }
 0x2e2   :  { %v208_v42 = vmul.f32 0.03125, %v204_v41 }
 0x2e4   :  { %v210_v43 = vadd.f32 1e-05, %v208_v42 }
 0x2e5   :  { %v207_v44 = vpop.xlane.xlu1 %206 }
 0x2e6   :  { %286 = vrsqrt.f32 %v210_v43  ;;  %v209_v45 = vmul.f32 0.03125, %v207_v44 }
 0x2e8   :  { %v211_v46 = vadd.f32 1e-05, %v209_v45 }
 0x2ea   :  { %288 = vrsqrt.f32 %v211_v46 }
 0x2f0   :  { %v287_v47 = vpop.eup %286 }
 0x2f1   :  { %v214_v49 = vmul.f32 %v287_v47, %v198_v33 }
 0x2f3   :  { %v222_v51 = vmul.f32 %v248_v48, %v214_v49 }
 0x2f4   :  { %v289_v52 = vpop.eup %288 }
 0x2f5   :  { %v230_v53 = vadd.f32 %v249_v50, %v222_v51  ;;  %v215_v54 = vmul.f32 %v289_v52, %v199_v37 }
 0x2f7   :  { %232 = vst.msk [vmem:[%s388_s7] sm:$0xff] %vm53_vm1, %v230_v53  ;;  %v223_v55 = vmul.f32 %v248_v48, %v215_v54 }
 0x2f9   :  { %v231_v56 = vadd.f32 %v249_v50, %v223_v55 }
 0x2fb   :  { %233 = vst.msk [vmem:[%s388_s7 + $0x8] sm:$0xff] %vm53_vm1, %v231_v56 }

</bundles_post_ra>
